<compile_context>
chip_gen: v6e
topology: v6e:2x2x1
jax: 0.10.0
libtpu: 0.0.40
codegen_flags: <defaults>
</compile_context>

<pallas_src>
import jax
import jax.numpy as jnp
from jax.experimental import pallas as pl
from jax.experimental.pallas import tpu as pltpu

IN_DIM = 28 * 28          # 784
IN_PAD = 896              # 7 * 128  (lane-dense K for layer 1)
HID = 512
OUT_DIM = 10
OUT_PAD = 128             # lane-dense output slab
TB_MAX = 512              # default max batch tile (review: 512-1024)


def _round_up(n, m):
    return ((n + m - 1) // m) * m


def _mlp3_kernel(x_ref,
                 w1_ref, b1_ref,
                 w2_ref, b2_ref,
                 w3_ref, b3_ref,
                 o_ref):
    # x_ref: (TB, IN_PAD) bf16 ; weights bf16 ; biases f32 ; o_ref (TB, OUT_PAD) f32
    x = x_ref[...]

    h = jnp.dot(x, w1_ref[...], preferred_element_type=jnp.float32) + b1_ref[...]
    h = jnp.maximum(h, 0.0).astype(jnp.bfloat16)

    h = jnp.dot(h, w2_ref[...], preferred_element_type=jnp.float32) + b2_ref[...]
    h = jnp.maximum(h, 0.0).astype(jnp.bfloat16)

    logits = jnp.dot(h, w3_ref[...], preferred_element_type=jnp.float32) + b3_ref[...]
    o_ref[...] = logits.astype(o_ref.dtype)


def _prep_params(params):
    """Cast to bf16 (weights) / f32 (biases); zero-pad to lane-dense shapes."""
    (w1, b1), (w2, b2), (w3, b3) = params
    w1p = jnp.pad(w1.astype(jnp.bfloat16), ((0, IN_PAD - IN_DIM), (0, 0)))
    w2p = w2.astype(jnp.bfloat16)
    w3p = jnp.pad(w3.astype(jnp.bfloat16), ((0, 0), (0, OUT_PAD - OUT_DIM)))
    b1p = b1.astype(jnp.float32)
    b2p = b2.astype(jnp.float32)
    b3p = jnp.pad(b3.astype(jnp.float32), ((0, 0), (0, OUT_PAD - OUT_DIM)))
    return w1p, b1p, w2p, b2p, w3p, b3p


def _choose_tile(B, tb_max):
    """Pick batch tile minimizing padding, aligned to bf16-sublane / MXU granules."""
    if B <= tb_max:
        # single grid step: 16-row granule (bf16 packs 2 rows/sublane) for small B,
        # 128-row granule (MXU tile) once the batch is big enough to fill it.
        g = 128 if B >= 128 else 16
        return _round_up(max(B, 16), g)
    # multi-tile: spread B evenly over the minimal number of tiles, 128-aligned.
    n_tiles = pl.cdiv(B, tb_max)
    return _round_up(pl.cdiv(B, n_tiles), 128)


def zknn_net_3layer_forward(x, params, tb_max=TB_MAX):
    """x: (B, 1, 28, 28) / (B, 28, 28) / (B, 784). Returns (B, 10) f32 logits."""
    B = x.shape[0]
    x2d = x.reshape(B, -1)                                # nn.Flatten()
    assert x2d.shape[1] == IN_DIM

    tb = _choose_tile(B, tb_max)
    n_tiles = pl.cdiv(B, tb)
    b_pad = n_tiles * tb

    # Cast to bf16 FIRST, then a single pad covering both feature (784->896)
    # and batch (B->b_pad) padding -- halves the HBM bytes moved by prep ops.
    xb = jnp.pad(x2d.astype(jnp.bfloat16),
                 ((0, b_pad - B), (0, IN_PAD - IN_DIM)))

    w1p, b1p, w2p, b2p, w3p, b3p = _prep_params(params)

    grid = (n_tiles,)
    const = lambda i: (0, 0)                              # weights resident across grid
    resident = pl.Buffered(1)                             # no 2nd buffer for constants

    flops = 2 * b_pad * (IN_PAD * HID + HID * HID + HID * OUT_PAD)
    bytes_accessed = (
        (IN_PAD * HID + HID * HID + HID * OUT_PAD) * 2    # bf16 weights (once)
        + (HID + HID + OUT_PAD) * 4                       # f32 biases
        + b_pad * IN_PAD * 2                              # bf16 activations in
        + b_pad * OUT_PAD * 4                             # f32 logits out
    )

    out = pl.pallas_call(
        _mlp3_kernel,
        out_shape=jax.ShapeDtypeStruct((b_pad, OUT_PAD), jnp.float32),
        grid=grid,
        in_specs=[
            pl.BlockSpec((tb, IN_PAD), lambda i: (i, 0)),                       # x tile
            pl.BlockSpec((IN_PAD, HID), const, pipeline_mode=resident),         # w1
            pl.BlockSpec((1, HID), const, pipeline_mode=resident),              # b1
            pl.BlockSpec((HID, HID), const, pipeline_mode=resident),            # w2
            pl.BlockSpec((1, HID), const, pipeline_mode=resident),              # b2
            pl.BlockSpec((HID, OUT_PAD), const, pipeline_mode=resident),        # w3
            pl.BlockSpec((1, OUT_PAD), const, pipeline_mode=resident),          # b3
        ],
        out_specs=pl.BlockSpec((tb, OUT_PAD), lambda i: (i, 0)),
        compiler_params=pltpu.CompilerParams(
            dimension_semantics=("parallel",),
            vmem_limit_bytes=32 << 20,
        ),
        cost_estimate=pl.CostEstimate(
            flops=flops, transcendentals=0, bytes_accessed=bytes_accessed),
    )(xb, w1p, b1p, w2p, b2p, w3p, b3p)

    return out[:B, :OUT_DIM]


def init_params(key):
    """nn.Linear-style uniform init. Weights stored transposed as (in, out) f32,
    biases as (1, out) f32 (cast/pad happens in the wrapper)."""
    dims = [(IN_DIM, HID), (HID, HID), (HID, OUT_DIM)]
    params = []
    keys = jax.random.split(key, len(dims) * 2)
    for i, (fan_in, fan_out) in enumerate(dims):
        bound = 1.0 / jnp.sqrt(fan_in)
        w = jax.random.uniform(keys[2 * i], (fan_in, fan_out),
                               minval=-bound, maxval=bound, dtype=jnp.float32)
        b = jax.random.uniform(keys[2 * i + 1], (1, fan_out),
                               minval=-bound, maxval=bound, dtype=jnp.float32)
        params.append((w, b))
    return params


def _reference_forward(x, params):
    """Pure-JAX reference using the same bf16 quantization of weights/activations."""
    B = x.shape[0]
    h = x.reshape(B, -1).astype(jnp.float32)
    h = h.astype(jnp.bfloat16).astype(jnp.float32)
    for i, (w, b) in enumerate(params):
        wq = w.astype(jnp.bfloat16).astype(jnp.float32)
        h = jnp.dot(h, wq, precision=jax.lax.Precision.HIGHEST) + b.astype(jnp.float32)
        if i < len(params) - 1:
            h = jnp.maximum(h, 0.0).astype(jnp.bfloat16).astype(jnp.float32)
    return h


if __name__ == "__main__":
    params = init_params(jax.random.PRNGKey(42))

    # MNIST-like inputs: (batch, 1, 28, 28). Small deterministic case.
    batch = 2
    x = jax.random.normal(jax.random.PRNGKey(0), (batch, 1, 28, 28), dtype=jnp.float32)
    logits = jax.block_until_ready(zknn_net_3layer_forward(x, params))
    ref = _reference_forward(x, params)
    assert logits.shape == (batch, OUT_DIM)
    assert jnp.allclose(logits, ref, atol=2e-3, rtol=2e-3)

    # Mid-size batch: now a single 384-row tile (no batch padding).
    batch2 = 384
    x2 = jax.random.normal(jax.random.PRNGKey(1), (batch2, 1, 28, 28), dtype=jnp.float32)
    logits2 = jax.block_until_ready(zknn_net_3layer_forward(x2, params))
    ref2 = _reference_forward(x2, params)
    assert logits2.shape == (batch2, OUT_DIM)
    assert jnp.allclose(logits2, ref2, atol=2e-3, rtol=2e-3)

    # Large batch: exercises the multi-tile pipelined grid (2 x 512-row tiles).
    batch3 = 1024
    x3 = jax.random.normal(jax.random.PRNGKey(2), (batch3, 1, 28, 28), dtype=jnp.float32)
    logits3 = jax.block_until_ready(zknn_net_3layer_forward(x3, params))
    ref3 = _reference_forward(x3, params)
    assert logits3.shape == (batch3, OUT_DIM)
    assert jnp.allclose(logits3, ref3, atol=2e-3, rtol=2e-3)

    print("KERNEL_OK")
</pallas_src>

<mosaic_0001>
module attributes {stable_mosaic.version = 11 : i64} {
  func.func @_mlp3_kernel(%arg0: i32, %arg1: memref<16x896xbf16, #tpu.memory_space<vmem>>, %arg2: memref<896x512xbf16, #tpu.memory_space<vmem>>, %arg3: memref<1x512xf32, #tpu.memory_space<vmem>>, %arg4: memref<512x512xbf16, #tpu.memory_space<vmem>>, %arg5: memref<1x512xf32, #tpu.memory_space<vmem>>, %arg6: memref<512x128xbf16, #tpu.memory_space<vmem>>, %arg7: memref<1x128xf32, #tpu.memory_space<vmem>>, %arg8: memref<16x128xf32, #tpu.memory_space<vmem>>) attributes {dimension_semantics = [#tpu.dimension_semantics<parallel>], iteration_bounds = array<i64: 1>, scalar_prefetch = 0 : i64, scratch_operands = 0 : i64, tpu.core_type = #tpu.core_type<tc>, window_params = [{transform_indices = @transform_0, window_bounds = array<i64: 16, 896>}, {pipeline_mode = #tpu.pipeline_mode<synchronous>, transform_indices = @transform_1, window_bounds = array<i64: 896, 512>}, {pipeline_mode = #tpu.pipeline_mode<synchronous>, transform_indices = @transform_2, window_bounds = array<i64: 1, 512>}, {pipeline_mode = #tpu.pipeline_mode<synchronous>, transform_indices = @transform_3, window_bounds = array<i64: 512, 512>}, {pipeline_mode = #tpu.pipeline_mode<synchronous>, transform_indices = @transform_4, window_bounds = array<i64: 1, 512>}, {pipeline_mode = #tpu.pipeline_mode<synchronous>, transform_indices = @transform_5, window_bounds = array<i64: 512, 128>}, {pipeline_mode = #tpu.pipeline_mode<synchronous>, transform_indices = @transform_6, window_bounds = array<i64: 1, 128>}, {transform_indices = @transform_7, window_bounds = array<i64: 16, 128>}]} {
    %c0 = arith.constant 0 : index
    %c0_0 = arith.constant 0 : index
    %0 = vector.load %arg1[%c0, %c0_0] : memref<16x896xbf16, #tpu.memory_space<vmem>>, vector<16x896xbf16>
    %c0_1 = arith.constant 0 : index
    %c0_2 = arith.constant 0 : index
    %1 = vector.load %arg2[%c0_1, %c0_2] : memref<896x512xbf16, #tpu.memory_space<vmem>>, vector<896x512xbf16>
    %cst = arith.constant dense<0.000000e+00> : vector<16x512xf32>
    %2 = tpu.matmul %0, %1, %cst {dimension_numbers = #tpu.dot_dimension_numbers<[1], [0], [0], [1], [0, 0, 1, 1], [], []>} : vector<16x896xbf16>, vector<896x512xbf16>, vector<16x512xf32> -> vector<16x512xf32>
    %c0_3 = arith.constant 0 : index
    %c0_4 = arith.constant 0 : index
    %3 = vector.load %arg3[%c0_3, %c0_4] : memref<1x512xf32, #tpu.memory_space<vmem>>, vector<1x512xf32>
    %4 = vector.broadcast %3 : vector<1x512xf32> to vector<16x512xf32>
    %5 = arith.addf %2, %4 : vector<16x512xf32>
    %cst_5 = arith.constant 0.000000e+00 : f32
    %6 = vector.broadcast %cst_5 : f32 to vector<16x512xf32>
    %7 = arith.maximumf %5, %6 : vector<16x512xf32>
    %8 = arith.truncf %7 : vector<16x512xf32> to vector<16x512xbf16>
    %c0_6 = arith.constant 0 : index
    %c0_7 = arith.constant 0 : index
    %9 = vector.load %arg4[%c0_6, %c0_7] : memref<512x512xbf16, #tpu.memory_space<vmem>>, vector<512x512xbf16>
    %cst_8 = arith.constant dense<0.000000e+00> : vector<16x512xf32>
    %10 = tpu.matmul %8, %9, %cst_8 {dimension_numbers = #tpu.dot_dimension_numbers<[1], [0], [0], [1], [0, 0, 1, 1], [], []>} : vector<16x512xbf16>, vector<512x512xbf16>, vector<16x512xf32> -> vector<16x512xf32>
    %c0_9 = arith.constant 0 : index
    %c0_10 = arith.constant 0 : index
    %11 = vector.load %arg5[%c0_9, %c0_10] : memref<1x512xf32, #tpu.memory_space<vmem>>, vector<1x512xf32>
    %12 = vector.broadcast %11 : vector<1x512xf32> to vector<16x512xf32>
    %13 = arith.addf %10, %12 : vector<16x512xf32>
    %cst_11 = arith.constant 0.000000e+00 : f32
    %14 = vector.broadcast %cst_11 : f32 to vector<16x512xf32>
    %15 = arith.maximumf %13, %14 : vector<16x512xf32>
    %16 = arith.truncf %15 : vector<16x512xf32> to vector<16x512xbf16>
    %c0_12 = arith.constant 0 : index
    %c0_13 = arith.constant 0 : index
    %17 = vector.load %arg6[%c0_12, %c0_13] : memref<512x128xbf16, #tpu.memory_space<vmem>>, vector<512x128xbf16>
    %cst_14 = arith.constant dense<0.000000e+00> : vector<16x128xf32>
    %18 = tpu.matmul %16, %17, %cst_14 {dimension_numbers = #tpu.dot_dimension_numbers<[1], [0], [0], [1], [0, 0, 1, 1], [], []>} : vector<16x512xbf16>, vector<512x128xbf16>, vector<16x128xf32> -> vector<16x128xf32>
    %c0_15 = arith.constant 0 : index
    %c0_16 = arith.constant 0 : index
    %19 = vector.load %arg7[%c0_15, %c0_16] : memref<1x128xf32, #tpu.memory_space<vmem>>, vector<1x128xf32>
    %20 = vector.broadcast %19 : vector<1x128xf32> to vector<16x128xf32>
    %21 = arith.addf %18, %20 : vector<16x128xf32>
    %c0_17 = arith.constant 0 : index
    %c0_18 = arith.constant 0 : index
    %22 = vector.load %arg8[%c0_17, %c0_18] : memref<16x128xf32, #tpu.memory_space<vmem>>, vector<16x128xf32>
    tpu.vector_store %arg8[%c0_17, %c0_18], %21 {strides = array<i32>} : memref<16x128xf32, #tpu.memory_space<vmem>>, vector<16x128xf32>,
    return
  }
  func.func @transform_0(%arg0: i32) -> (i32, i32) {
    %c0_i32 = arith.constant 0 : i32
    %c0_i32_0 = arith.constant 0 : i32
    return %arg0, %c0_i32 : i32, i32
  }
  func.func @transform_1(%arg0: i32) -> (i32, i32) {
    %c0_i32 = arith.constant 0 : i32
    %c0_i32_0 = arith.constant 0 : i32
    %c0_i32_1 = arith.constant 0 : i32
    return %c0_i32, %c0_i32_0 : i32, i32
  }
  func.func @transform_2(%arg0: i32) -> (i32, i32) {
    %c0_i32 = arith.constant 0 : i32
    %c0_i32_0 = arith.constant 0 : i32
    %c0_i32_1 = arith.constant 0 : i32
    return %c0_i32, %c0_i32_0 : i32, i32
  }
  func.func @transform_3(%arg0: i32) -> (i32, i32) {
    %c0_i32 = arith.constant 0 : i32
    %c0_i32_0 = arith.constant 0 : i32
    %c0_i32_1 = arith.constant 0 : i32
    return %c0_i32, %c0_i32_0 : i32, i32
  }
  func.func @transform_4(%arg0: i32) -> (i32, i32) {
    %c0_i32 = arith.constant 0 : i32
    %c0_i32_0 = arith.constant 0 : i32
    %c0_i32_1 = arith.constant 0 : i32
    return %c0_i32, %c0_i32_0 : i32, i32
  }
  func.func @transform_5(%arg0: i32) -> (i32, i32) {
    %c0_i32 = arith.constant 0 : i32
    %c0_i32_0 = arith.constant 0 : i32
    %c0_i32_1 = arith.constant 0 : i32
    return %c0_i32, %c0_i32_0 : i32, i32
  }
  func.func @transform_6(%arg0: i32) -> (i32, i32) {
    %c0_i32 = arith.constant 0 : i32
    %c0_i32_0 = arith.constant 0 : i32
    %c0_i32_1 = arith.constant 0 : i32
    return %c0_i32, %c0_i32_0 : i32, i32
  }
  func.func @transform_7(%arg0: i32) -> (i32, i32) {
    %c0_i32 = arith.constant 0 : i32
    %c0_i32_0 = arith.constant 0 : i32
    return %arg0, %c0_i32 : i32, i32
  }
}

</mosaic_0001>

<bundles_post_ra>
// kernel: tpu_custom_call.1
= control target key start
LH: loop header
LB: loop body
LE: loop exit
PB: predicated region body
PF: predicated region fallthrough
CT: control target
= control target key end

     0   :  { %12 = vsyncpa [#allocation3], 0  ;;  %s4488_s0 = inlined_call_operand.hbm [shape: bf16[16,896], index: 0, kind: input, shape index: {}]   ;;  %s4489_s1 = inlined_call_operand.hbm [shape: bf16[896,512], index: 1, kind: input, shape index: {}]   ;;  %s4490_s2 = inlined_call_operand.hbm [shape: f32[1,512], index: 2, kind: input, shape index: {}]   ;;  %s4491_s3 = inlined_call_operand.hbm [shape: bf16[512,512], index: 3, kind: input, shape index: {}]   ;;  %s4492_s4 = inlined_call_operand.vmem [shape: f32[1,512], index: 4, kind: input, shape index: {}]   ;;  %s4493_s5 = inlined_call_operand.hbm [shape: bf16[512,128], index: 5, kind: input, shape index: {}]   ;;  %s4494_s6 = inlined_call_operand.vmem [shape: f32[1,128], index: 6, kind: input, shape index: {}]   ;;  %s4495_s7 = inlined_call_operand.hbm [shape: f32[16,128], index: 7, kind: output, shape index: {}]  }
   0x1   :  { %13 = vsyncpa [#allocation6], 0 }
   0x2   :  { %14 = vsyncpa [#allocation9], 0 }
   0x3   :  { %15 = vsyncpa [#allocation4], 0  ;;  %s4351_s24 = smov [#allocation5]  }
   0x4   :  { %s33_s25 = sshll.u32 %s4351_s24, 4  ;;  %s34_s25 = int_to_ptr.vmem [resolvable:$true] %s33_s25 }
   0x5   :  { %s4231_s26 = scalar_lea.vmem %s34_s25, 28672  ;;  %p4236_p1 = scmp.lt.s32.totalorder %s34_s25, %s34_s25 }
   0x6   :  { %p4232_p0 = scmp.ne.s32.totalorder %s34_s25, %s4231_s26  ;;  %p4237_p2 = scmp.lt.s32.totalorder %s4231_s26, %s4231_s26 }
   0x8   :  { %p4238_p3 = por %p4237_p2, %p4236_p1 }
   0xa   :  { %p4239_p4 = pnand %p4238_p3, %p4232_p0 }
   0xc   :  { %4242 = shalt.err (!%p4239_p4)
}
   0xd   :  { %s4352_s27 = smov 256   ;;  %s4353_s28 = smov 16  }
   0xe   :  { %39 = dma.hbm_to_vmem [thread:$0]  %s4489_s1, 28672, %s34_s25, [#allocation6], %s4352_s27, %s4352_s27, %s4353_s28  }
   0xf   :  { %s4354_s8 = smov [#allocation8]   ;;  %s4355_s10 = smov [#allocation2]  }
  0x10   :  { %s55_s9 = sshll.u32 %s4354_s8, 4  ;;  %s21_s11 = sshll.u32 %s4355_s10, 4  ;;  %s56_s9 = int_to_ptr.vmem [resolvable:$true] %s55_s9  ;;  %s22_s11 = int_to_ptr.vmem [resolvable:$true] %s21_s11 }
  0x11   :  { %s4251_s12 = scalar_lea.vmem %s56_s9, 16384  ;;  %p4256_p6 = scmp.lt.s32.totalorder %s56_s9, %s56_s9 }
  0x12   :  { %p4252_p5 = scmp.ne.s32.totalorder %s56_s9, %s4251_s12  ;;  %p4257_p7 = scmp.lt.s32.totalorder %s4251_s12, %s4251_s12 }
  0x14   :  { %p4258_p8 = por %p4257_p7, %p4256_p6 }
  0x16   :  { %p4259_p9 = pnand %p4258_p8, %p4252_p5 }
  0x18   :  { %4262 = shalt.err (!%p4259_p9)
}
  0x19   :  { %61 = dma.hbm_to_vmem [thread:$0]  %s4491_s3, 16384, %s56_s9, [#allocation9], %s4352_s27, %s4352_s27, %s4353_s28  }
  0x1a   :  { %s4271_s15 = scalar_lea.vmem %s22_s11, 896  ;;  %p4276_p11 = scmp.lt.s32.totalorder %s22_s11, %s22_s11 }
  0x1b   :  { %p4272_p10 = scmp.ne.s32.totalorder %s22_s11, %s4271_s15  ;;  %p4277_p12 = scmp.lt.s32.totalorder %s4271_s15, %s4271_s15 }
  0x1d   :  { %p4278_p13 = por %p4277_p12, %p4276_p11 }
  0x1f   :  { %p4279_p0 = pnand %p4278_p13, %p4272_p10 }
  0x21   :  { %4282 = shalt.err (!%p4279_p0)
}
  0x22   :  { %s4356_s1 = smov 448   ;;  %s4357_s16 = smov 28  }
  0x23   :  { %27 = dma.hbm_to_vmem [thread:$0]  %s4488_s0, 896, %s22_s11, [#allocation3], %s4356_s1, %s4356_s1, %s4357_s16  }
  0x24   :  { %s4358_s19 = smov [#allocation7]   ;;  %s4359_s21 = smov [#allocation10]  }
  0x25   :  { %s46_s20 = sshll.u32 %s4358_s19, 4  ;;  %s69_s22 = sshll.u32 %s4359_s21, 4  ;;  %s47_s20 = int_to_ptr.vmem [resolvable:$true] %s46_s20  ;;  %s70_s22 = int_to_ptr.vmem [resolvable:$true] %s69_s22 }
  0x26   :  { %s4291_s3 = scalar_lea.vmem %s47_s20, 64  ;;  %p4296_p2 = scmp.lt.s32.totalorder %s47_s20, %s47_s20 }
  0x27   :  { %p4292_p1 = scmp.ne.s32.totalorder %s47_s20, %s4291_s3  ;;  %p4297_p3 = scmp.lt.s32.totalorder %s4291_s3, %s4291_s3 }
  0x29   :  { %p4298_p4 = por %p4297_p3, %p4296_p2 }
  0x2b   :  { %p4299_p5 = pnand %p4298_p4, %p4292_p1 }
  0x2d   :  { %4302 = shalt.err (!%p4299_p5)
}
  0x2e   :  { %49 = dma.hbm_to_vmem [thread:$0]  %s4490_s2, 64, %s47_s20, [#allocation6]  }
  0x2f   :  { %s4311_s25 = scalar_lea.vmem %s70_s22, 4096  ;;  %p4316_p7 = scmp.lt.s32.totalorder %s70_s22, %s70_s22 }
  0x30   :  { %p4312_p6 = scmp.ne.s32.totalorder %s70_s22, %s4311_s25  ;;  %p4317_p8 = scmp.lt.s32.totalorder %s4311_s25, %s4311_s25 }
  0x32   :  { %p4318_p9 = por %p4317_p8, %p4316_p7 }
  0x34   :  { %p4319_p10 = pnand %p4318_p9, %p4312_p6 }
  0x36   :  { %4322 = shalt.err (!%p4319_p10)
}
  0x37   :  { %s4360_s0 = smov 64   ;;  %s4361_s26 = smov 4  }
  0x38   :  { %75 = dma.hbm_to_vmem [thread:$0]  %s4493_s5, 4096, %s70_s22, [#allocation9], %s4360_s0, %s4360_s0, %s4361_s26  }
  0x39   :  { %4343 = dma.done.wait [#allocation3], 896  }
  0x3a   :  { %4344 = vsyncadd [#allocation3], 4294966400 }
  0x3b   :  { %4345 = dma.done.wait [#allocation6], 28736  }
  0x3c   :  { %4346 = vsyncadd [#allocation6], 4294938560 }
  0x3d   :  { %4347 = dma.done.wait [#allocation9], 20480  }
  0x3e   :  { %4348 = vsyncadd [#allocation9], 4294946816  ;;  %v3651_v0 = vld [vmem:[#allocation5 + $0xe4] ss:$16 sps:$4 sm:$0xff]   ;;  %v3655_v2 = vld [vmem:[#allocation5 + $0xe0] ss:$16 sps:$4 sm:$0xff]  }
  0x3f   :  { %v3653_v1 = vld [vmem:[#allocation5 + $0x2e4] ss:$16 sps:$4 sm:$0xff]   ;;  %1504 = vmatprep.subr.bf16.mxu0 %v3651_v0  ;;  %v3656_v3 = vld [vmem:[#allocation5 + $0x2e0] ss:$16 sps:$4 sm:$0xff]   ;;  %v4421_v49 = vld [vmem:[#allocation2 + $0x4] ss:$28 sps:$4 sm:$0xff]  }
  0x40   :  { %1547 = vmatprep.subr.bf16.mxu1 %v3653_v1  ;;  %v3657_v4 = vld [vmem:[#allocation5 + $0xc4] ss:$16 sps:$4 sm:$0xff]   ;;  %1505 = vmatpush1.bf16.msra.mxu0 %v3655_v2  ;;  %v3661_v6 = vld [vmem:[#allocation5 + $0xc0] ss:$16 sps:$4 sm:$0xff]   ;;  %s4363_s30 = smov [#allocation11]  }
  0x41   :  { %1548 = vmatpush1.bf16.msra.mxu1 %v3656_v3  ;;  %v3659_v5 = vld [vmem:[#allocation5 + $0x2c4] ss:$16 sps:$4 sm:$0xff]   ;;  %1506 = vmatprep.subr.bf16.mxu0 %v3657_v4  ;;  %v3662_v7 = vld [vmem:[#allocation5 + $0x2c0] ss:$16 sps:$4 sm:$0xff]   ;;  %s3186_s8 = sshll.u32 %s4363_s30, 4  ;;  %s3187_s8 = int_to_ptr.vmem [resolvable:$true] %s3186_s8 }
  0x42   :  { %1549 = vmatprep.subr.bf16.mxu1 %v3659_v5  ;;  %v3663_v8 = vld [vmem:[#allocation5 + $0xa4] ss:$16 sps:$4 sm:$0xff]   ;;  %v3667_v10 = vld [vmem:[#allocation5 + $0xa0] ss:$16 sps:$4 sm:$0xff]   ;;  %1536 = vmatprep.mubr.bf16.mxu0 %v4421_v49  ;;  %s4323_s9 = scalar_lea.vmem %s3187_s8, 256  ;;  %p4328_p12 = scmp.lt.s32.totalorder %s3187_s8, %s3187_s8 }
  0x43   :  { %v3665_v9 = vld [vmem:[#allocation5 + $0x2a4] ss:$16 sps:$4 sm:$0xff]   ;;  %v3668_v11 = vld [vmem:[#allocation5 + $0x2a0] ss:$16 sps:$4 sm:$0xff]   ;;  %p4324_p11 = scmp.ne.s32.totalorder %s3187_s8, %s4323_s9  ;;  %p4329_p13 = scmp.lt.s32.totalorder %s4323_s9, %s4323_s9 }
  0x44   :  { %1507 = vmatpush1.bf16.msra.mxu0 %v3661_v6  ;;  %v3669_v12 = vld [vmem:[#allocation5 + $0x84] ss:$16 sps:$4 sm:$0xff]   ;;  %v3673_v14 = vld [vmem:[#allocation5 + $0x80] ss:$16 sps:$4 sm:$0xff]  }
  0x45   :  { %1550 = vmatpush1.bf16.msra.mxu1 %v3662_v7  ;;  %1508 = vmatprep.subr.bf16.mxu0 %v3663_v8  ;;  %v3671_v13 = vld [vmem:[#allocation5 + $0x284] ss:$16 sps:$4 sm:$0xff]   ;;  %v3674_v15 = vld [vmem:[#allocation5 + $0x280] ss:$16 sps:$4 sm:$0xff]   ;;  %p4330_p0 = por %p4329_p13, %p4328_p12 }
  0x46   :  { %1551 = vmatprep.subr.bf16.mxu1 %v3665_v9  ;;  %v3675_v16 = vld [vmem:[#allocation5 + $0x64] ss:$16 sps:$4 sm:$0xff]   ;;  %v3679_v18 = vld [vmem:[#allocation5 + $0x60] ss:$16 sps:$4 sm:$0xff]  }
  0x47   :  { %v3677_v17 = vld [vmem:[#allocation5 + $0x264] ss:$16 sps:$4 sm:$0xff]   ;;  %v3680_v19 = vld [vmem:[#allocation5 + $0x260] ss:$16 sps:$4 sm:$0xff]   ;;  %p4331_p1 = pnand %p4330_p0, %p4324_p11 }
  0x48   :  { %1509 = vmatpush1.bf16.msra.mxu0 %v3667_v10  ;;  %v3681_v20 = vld [vmem:[#allocation5 + $0x44] ss:$16 sps:$4 sm:$0xff]   ;;  %v3685_v22 = vld [vmem:[#allocation5 + $0x40] ss:$16 sps:$4 sm:$0xff]  }
  0x49   :  { %1552 = vmatpush1.bf16.msra.mxu1 %v3668_v11  ;;  %1510 = vmatprep.subr.bf16.mxu0 %v3669_v12  ;;  %v3683_v21 = vld [vmem:[#allocation5 + $0x244] ss:$16 sps:$4 sm:$0xff]   ;;  %v3686_v23 = vld [vmem:[#allocation5 + $0x240] ss:$16 sps:$4 sm:$0xff]  }
  0x4a   :  { %1553 = vmatprep.subr.bf16.mxu1 %v3671_v13  ;;  %v3687_v24 = vld [vmem:[#allocation5 + $0x24] ss:$16 sps:$4 sm:$0xff]   ;;  %v3691_v26 = vld [vmem:[#allocation5 + $0x20] ss:$16 sps:$4 sm:$0xff]  }
  0x4b   :  { %v3689_v25 = vld [vmem:[#allocation5 + $0x224] ss:$16 sps:$4 sm:$0xff]   ;;  %v3692_v27 = vld [vmem:[#allocation5 + $0x220] ss:$16 sps:$4 sm:$0xff]  }
  0x4c   :  { %1511 = vmatpush1.bf16.msra.mxu0 %v3673_v14  ;;  %v3693_v28 = vld [vmem:[#allocation5 + $0x4] ss:$16 sps:$4 sm:$0xff]   ;;  %v3697_v30 = vld [vmem:[#allocation5] ss:$16 sps:$4 sm:$0xff]   ;;  %v4362_v14 = vmov 0  }
  0x4d   :  { %1554 = vmatpush1.bf16.msra.mxu1 %v3674_v15  ;;  %1512 = vmatprep.subr.bf16.mxu0 %v3675_v16  ;;  %v3695_v29 = vld [vmem:[#allocation5 + $0x204] ss:$16 sps:$4 sm:$0xff]   ;;  %v3698_v31 = vld [vmem:[#allocation5 + $0x200] ss:$16 sps:$4 sm:$0xff]  }
  0x4e   :  { %1555 = vmatprep.subr.bf16.mxu1 %v3677_v17  ;;  %v3699_v32 = vld [vmem:[#allocation5 + $0x1e4] ss:$16 sps:$4 sm:$0xff]   ;;  %v3703_v34 = vld [vmem:[#allocation5 + $0x1e0] ss:$16 sps:$4 sm:$0xff]  }
  0x4f   :  { %v3701_v33 = vld [vmem:[#allocation5 + $0x3e4] ss:$16 sps:$4 sm:$0xff]   ;;  %v3704_v35 = vld [vmem:[#allocation5 + $0x3e0] ss:$16 sps:$4 sm:$0xff]  }
  0x50   :  { %1513 = vmatpush1.bf16.msra.mxu0 %v3679_v18  ;;  %v3705_v36 = vld [vmem:[#allocation5 + $0x1c4] ss:$16 sps:$4 sm:$0xff]   ;;  %v3709_v38 = vld [vmem:[#allocation5 + $0x1c0] ss:$16 sps:$4 sm:$0xff]  }
  0x51   :  { %1556 = vmatpush1.bf16.msra.mxu1 %v3680_v19  ;;  %1514 = vmatprep.subr.bf16.mxu0 %v3681_v20  ;;  %v3707_v37 = vld [vmem:[#allocation5 + $0x3c4] ss:$16 sps:$4 sm:$0xff]   ;;  %v3710_v39 = vld [vmem:[#allocation5 + $0x3c0] ss:$16 sps:$4 sm:$0xff]  }
  0x52   :  { %1557 = vmatprep.subr.bf16.mxu1 %v3683_v21  ;;  %v3711_v40 = vld [vmem:[#allocation5 + $0x1a4] ss:$16 sps:$4 sm:$0xff]   ;;  %v3715_v42 = vld [vmem:[#allocation5 + $0x1a0] ss:$16 sps:$4 sm:$0xff]  }
  0x53   :  { %v3713_v41 = vld [vmem:[#allocation5 + $0x3a4] ss:$16 sps:$4 sm:$0xff]   ;;  %v3716_v43 = vld [vmem:[#allocation5 + $0x3a0] ss:$16 sps:$4 sm:$0xff]  }
  0x54   :  { %1515 = vmatpush1.bf16.msra.mxu0 %v3685_v22  ;;  %v3717_v44 = vld [vmem:[#allocation5 + $0x184] ss:$16 sps:$4 sm:$0xff]   ;;  %v3721_v46 = vld [vmem:[#allocation5 + $0x180] ss:$16 sps:$4 sm:$0xff]  }
  0x55   :  { %1558 = vmatpush1.bf16.msra.mxu1 %v3686_v23  ;;  %1516 = vmatprep.subr.bf16.mxu0 %v3687_v24  ;;  %v3719_v45 = vld [vmem:[#allocation5 + $0x384] ss:$16 sps:$4 sm:$0xff]   ;;  %v3722_v47 = vld [vmem:[#allocation5 + $0x380] ss:$16 sps:$4 sm:$0xff]  }
  0x56   :  { %1559 = vmatprep.subr.bf16.mxu1 %v3689_v25  ;;  %v3723_v48 = vld [vmem:[#allocation5 + $0x164] ss:$16 sps:$4 sm:$0xff]   ;;  %v3727_v52 = vld [vmem:[#allocation5 + $0x160] ss:$16 sps:$4 sm:$0xff]  }
  0x57   :  { %v3725_v50 = vld [vmem:[#allocation5 + $0x364] ss:$16 sps:$4 sm:$0xff]   ;;  %v3728_v53 = vld [vmem:[#allocation5 + $0x360] ss:$16 sps:$4 sm:$0xff]  }
  0x58   :  { %1517 = vmatpush1.bf16.msra.mxu0 %v3691_v26  ;;  %v4423_v51 = vld [vmem:[#allocation2 + $0xc] ss:$28 sps:$4 sm:$0xff]   ;;  %v4427_v4 = vld [vmem:[#allocation2] ss:$28 sps:$4 sm:$0xff]  }
  0x59   :  { %1560 = vmatpush1.bf16.msra.mxu1 %v3692_v27  ;;  %1518 = vmatprep.subr.bf16.mxu0 %v3693_v28  ;;  %v3729_v54 = vld [vmem:[#allocation5 + $0x144] ss:$16 sps:$4 sm:$0xff]   ;;  %v3733_v56 = vld [vmem:[#allocation5 + $0x140] ss:$16 sps:$4 sm:$0xff]  }
  0x5a   :  { %1561 = vmatprep.subr.bf16.mxu1 %v3695_v29  ;;  %1579 = vmatprep.mubr.bf16.mxu1 %v4423_v51  ;;  %v3731_v55 = vld [vmem:[#allocation5 + $0x344] ss:$16 sps:$4 sm:$0xff]   ;;  %v3734_v57 = vld [vmem:[#allocation5 + $0x340] ss:$16 sps:$4 sm:$0xff]  }
  0x5b   :  { %v3735_v58 = vld [vmem:[#allocation5 + $0x124] ss:$16 sps:$4 sm:$0xff]   ;;  %v3739_v60 = vld [vmem:[#allocation5 + $0x120] ss:$16 sps:$4 sm:$0xff]  }
  0x5c   :  { %1519 = vmatpush1.bf16.msra.mxu0 %v3697_v30  ;;  %v3737_v59 = vld [vmem:[#allocation5 + $0x324] ss:$16 sps:$4 sm:$0xff]   ;;  %v3740_v61 = vld [vmem:[#allocation5 + $0x320] ss:$16 sps:$4 sm:$0xff]  }
  0x5d   :  { %1562 = vmatpush1.bf16.msra.mxu1 %v3698_v31  ;;  %1520 = vmatprep.subr.bf16.mxu0 %v3699_v32  ;;  %v3741_v62 = vld [vmem:[#allocation5 + $0x104] ss:$16 sps:$4 sm:$0xff]   ;;  %v3745_v0 = vld [vmem:[#allocation5 + $0x100] ss:$16 sps:$4 sm:$0xff]  }
  0x5e   :  { %1563 = vmatprep.subr.bf16.mxu1 %v3701_v33  ;;  %v3743_v63 = vld [vmem:[#allocation5 + $0x304] ss:$16 sps:$4 sm:$0xff]   ;;  %v3746_v1 = vld [vmem:[#allocation5 + $0x300] ss:$16 sps:$4 sm:$0xff]  }
  0x5f   :  { %v3755_v2 = vld [vmem:[#allocation5 + $0x4e4] ss:$16 sps:$4 sm:$0xff]   ;;  %v3750_v5 = vld [vmem:[#allocation2 + $0x8] ss:$28 sps:$4 sm:$0xff]  }
  0x60   :  { %1521 = vmatpush2.bf16.msra.mxu0 %v3703_v34  ;;  %v3758_v3 = vld [vmem:[#allocation5 + $0x6e4] ss:$16 sps:$4 sm:$0xff]   ;;  %v3753_v6 = vld [vmem:[#allocation5 + $0x4e0] ss:$16 sps:$4 sm:$0xff]  }
  0x61   :  { %1564 = vmatpush2.bf16.msra.mxu1 %v3704_v35  ;;  %1522 = vmatprep.subr.bf16.mxu0 %v3705_v36  ;;  %v3756_v7 = vld [vmem:[#allocation5 + $0x6e0] ss:$16 sps:$4 sm:$0xff]   ;;  %v3761_v8 = vld [vmem:[#allocation5 + $0x4c4] ss:$16 sps:$4 sm:$0xff]   ;;  %v4431_v35 = vld [vmem:[#allocation2 + $0x14] ss:$28 sps:$4 sm:$0xff]  }
  0x62   :  { %1565 = vmatprep.subr.bf16.mxu1 %v3707_v37  ;;  %v3764_v9 = vld [vmem:[#allocation5 + $0x6c4] ss:$16 sps:$4 sm:$0xff]   ;;  %v3759_v10 = vld [vmem:[#allocation5 + $0x4c0] ss:$16 sps:$4 sm:$0xff]  }
  0x63   :  { %v3762_v11 = vld [vmem:[#allocation5 + $0x6c0] ss:$16 sps:$4 sm:$0xff]   ;;  %v3767_v12 = vld [vmem:[#allocation5 + $0x4a4] ss:$16 sps:$4 sm:$0xff]  }
  0x64   :  { %1523 = vmatpush2.bf16.msra.mxu0 %v3709_v38  ;;  %v3770_v13 = vld [vmem:[#allocation5 + $0x6a4] ss:$16 sps:$4 sm:$0xff]   ;;  %v3765_v15 = vld [vmem:[#allocation5 + $0x4a0] ss:$16 sps:$4 sm:$0xff]  }
  0x65   :  { %1566 = vmatpush2.bf16.msra.mxu1 %v3710_v39  ;;  %1524 = vmatprep.subr.bf16.mxu0 %v3711_v40  ;;  %v3768_v16 = vld [vmem:[#allocation5 + $0x6a0] ss:$16 sps:$4 sm:$0xff]   ;;  %v3773_v17 = vld [vmem:[#allocation5 + $0x484] ss:$16 sps:$4 sm:$0xff]   ;;  %v3807_v39 = vld [vmem:[#allocation5 + $0xec] ss:$16 sps:$4 sm:$0xff]  }
  0x66   :  { %1567 = vmatprep.subr.bf16.mxu1 %v3713_v41  ;;  %v3776_v18 = vld [vmem:[#allocation5 + $0x684] ss:$16 sps:$4 sm:$0xff]   ;;  %v3771_v19 = vld [vmem:[#allocation5 + $0x480] ss:$16 sps:$4 sm:$0xff]  }
  0x67   :  { %v3774_v20 = vld [vmem:[#allocation5 + $0x680] ss:$16 sps:$4 sm:$0xff]   ;;  %v3779_v21 = vld [vmem:[#allocation5 + $0x464] ss:$16 sps:$4 sm:$0xff]  }
  0x68   :  { %1525 = vmatpush2.bf16.msra.mxu0 %v3715_v42  ;;  %v3782_v22 = vld [vmem:[#allocation5 + $0x664] ss:$16 sps:$4 sm:$0xff]   ;;  %v3777_v23 = vld [vmem:[#allocation5 + $0x460] ss:$16 sps:$4 sm:$0xff]   ;;  %v3805_v42 = vld [vmem:[#allocation5 + $0xe8] ss:$16 sps:$4 sm:$0xff]  }
  0x69   :  { %1568 = vmatpush2.bf16.msra.mxu1 %v3716_v43  ;;  %1526 = vmatprep.subr.bf16.mxu0 %v3717_v44  ;;  %v3780_v24 = vld [vmem:[#allocation5 + $0x660] ss:$16 sps:$4 sm:$0xff]   ;;  %v3785_v25 = vld [vmem:[#allocation5 + $0x444] ss:$16 sps:$4 sm:$0xff]   ;;  %v3813_v44 = vld [vmem:[#allocation5 + $0xcc] ss:$16 sps:$4 sm:$0xff]  }
  0x6a   :  { %1569 = vmatprep.subr.bf16.mxu1 %v3719_v45  ;;  %v3788_v26 = vld [vmem:[#allocation5 + $0x644] ss:$16 sps:$4 sm:$0xff]   ;;  %v3783_v27 = vld [vmem:[#allocation5 + $0x440] ss:$16 sps:$4 sm:$0xff]  }
  0x6b   :  { %v3786_v28 = vld [vmem:[#allocation5 + $0x640] ss:$16 sps:$4 sm:$0xff]   ;;  %v3791_v29 = vld [vmem:[#allocation5 + $0x424] ss:$16 sps:$4 sm:$0xff]  }
  0x6c   :  { %1527 = vmatpush2.bf16.msra.mxu0 %v3721_v46  ;;  %v3794_v30 = vld [vmem:[#allocation5 + $0x624] ss:$16 sps:$4 sm:$0xff]   ;;  %v3789_v31 = vld [vmem:[#allocation5 + $0x420] ss:$16 sps:$4 sm:$0xff]   ;;  %v3811_v46 = vld [vmem:[#allocation5 + $0xc8] ss:$16 sps:$4 sm:$0xff]  }
  0x6d   :  { %1570 = vmatpush2.bf16.msra.mxu1 %v3722_v47  ;;  %1528 = vmatprep.subr.bf16.mxu0 %v3723_v48  ;;  %v3792_v32 = vld [vmem:[#allocation5 + $0x620] ss:$16 sps:$4 sm:$0xff]   ;;  %v3797_v33 = vld [vmem:[#allocation5 + $0x404] ss:$16 sps:$4 sm:$0xff]   ;;  %v3819_v48 = vld [vmem:[#allocation5 + $0xac] ss:$16 sps:$4 sm:$0xff]  }
  0x6e   :  { %1571 = vmatprep.subr.bf16.mxu1 %v3725_v50  ;;  %v3800_v34 = vld [vmem:[#allocation5 + $0x604] ss:$16 sps:$4 sm:$0xff]   ;;  %v3795_v36 = vld [vmem:[#allocation5 + $0x400] ss:$16 sps:$4 sm:$0xff]  }
  0x6f   :  { %v3798_v37 = vld [vmem:[#allocation5 + $0x600] ss:$16 sps:$4 sm:$0xff]   ;;  %v3803_v38 = vld [vmem:[#allocation5 + $0x5e4] ss:$16 sps:$4 sm:$0xff]  }
  0x70   :  { %1529 = vmatpush2.bf16.msra.mxu0 %v3727_v52  ;;  %v3801_v40 = vld [vmem:[#allocation5 + $0x5e0] ss:$16 sps:$4 sm:$0xff]   ;;  %v3810_v43 = vld [vmem:[#allocation5 + $0x5c4] ss:$16 sps:$4 sm:$0xff]   ;;  %v3817_v52 = vld [vmem:[#allocation5 + $0xa8] ss:$16 sps:$4 sm:$0xff]  }
  0x71   :  { %1572 = vmatpush2.bf16.msra.mxu1 %v3728_v53  ;;  %1530 = vmatprep.subr.bf16.mxu0 %v3729_v54  ;;  %v3804_v41 = vld [vmem:[#allocation2 + $0x18] ss:$28 sps:$4 sm:$0xff]   ;;  %v3816_v47 = vld [vmem:[#allocation5 + $0x5a4] ss:$16 sps:$4 sm:$0xff]  }
  0x72   :  { %1573 = vmatprep.subr.bf16.mxu1 %v3731_v55  ;;  %v3808_v45 = vld [vmem:[#allocation5 + $0x5c0] ss:$16 sps:$4 sm:$0xff]   ;;  %v3822_v53 = vld [vmem:[#allocation5 + $0x584] ss:$16 sps:$4 sm:$0xff]   ;;  %v3825_v54 = vld [vmem:[#allocation5 + $0x8c] ss:$16 sps:$4 sm:$0xff]  }
  0x73   :  { %v3814_v50 = vld [vmem:[#allocation5 + $0x5a0] ss:$16 sps:$4 sm:$0xff]  }
  0x74   :  { %1531 = vmatpush2.bf16.msra.mxu0 %v3733_v56  ;;  %v3820_v55 = vld [vmem:[#allocation5 + $0x580] ss:$16 sps:$4 sm:$0xff]   ;;  %v3823_v56 = vld [vmem:[#allocation5 + $0x88] ss:$16 sps:$4 sm:$0xff]  }
  0x75   :  { %1574 = vmatpush2.bf16.msra.mxu1 %v3734_v57  ;;  %1532 = vmatprep.subr.bf16.mxu0 %v3735_v58  ;;  %v3828_v57 = vld [vmem:[#allocation5 + $0x564] ss:$16 sps:$4 sm:$0xff]   ;;  %v3831_v58 = vld [vmem:[#allocation5 + $0x6c] ss:$16 sps:$4 sm:$0xff]  }
  0x76   :  { %1575 = vmatprep.subr.bf16.mxu1 %v3737_v59  ;;  %v3826_v59 = vld [vmem:[#allocation5 + $0x560] ss:$16 sps:$4 sm:$0xff]  }
  0x78   :  { %1533 = vmatpush2.bf16.msra.mxu0 %v3739_v60  ;;  %v3834_v60 = vld [vmem:[#allocation5 + $0x544] ss:$16 sps:$4 sm:$0xff]  }
  0x79   :  { %1576 = vmatpush2.bf16.msra.mxu1 %v3740_v61  ;;  %1534 = vmatprep.subr.bf16.mxu0 %v3741_v62  ;;  %v3837_v61 = vld [vmem:[#allocation5 + $0x4c] ss:$16 sps:$4 sm:$0xff]   ;;  %v3832_v62 = vld [vmem:[#allocation5 + $0x540] ss:$16 sps:$4 sm:$0xff]  }
  0x7a   :  { %1577 = vmatprep.subr.bf16.mxu1 %v3743_v63  ;;  %v3835_v63 = vld [vmem:[#allocation5 + $0x48] ss:$16 sps:$4 sm:$0xff]  }
  0x7c   :  { %1535 = vmatpush2.bf16.msra.mxu0 %v3745_v0  ;;  %v3840_v0 = vld [vmem:[#allocation5 + $0x524] ss:$16 sps:$4 sm:$0xff]  }
  0x7d   :  { %1578 = vmatpush2.bf16.msra.mxu1 %v3746_v1  ;;  %1590 = vmatprep.subr.bf16.mxu0 %v3755_v2  ;;  %v3843_v1 = vld [vmem:[#allocation5 + $0x2c] ss:$16 sps:$4 sm:$0xff]   ;;  %v3838_v2 = vld [vmem:[#allocation5 + $0x520] ss:$16 sps:$4 sm:$0xff]  }
  0x7e   :  { %1633 = vmatprep.subr.bf16.mxu1 %v3758_v3  ;;  %v3841_v3 = vld [vmem:[#allocation5 + $0x28] ss:$16 sps:$4 sm:$0xff]  }
  0x7f   :  { %1537 = vmatmul.mubr.bf16.vlgmr.msra.gmra.mxu0 %v4427_v4 }
  0x80   :  { %1580 = vmatmul.mubr.bf16.vlgmr.msra.gmra.mxu1 %v3750_v5  ;;  %1591 = vmatpush1.bf16.msra.mxu0 %v3753_v6  ;;  %v3846_v5 = vld [vmem:[#allocation5 + $0x504] ss:$16 sps:$4 sm:$0xff]   ;;  %v3849_v6 = vld [vmem:[#allocation5 + $0xc] ss:$16 sps:$4 sm:$0xff]  }
  0x81   :  { %1634 = vmatpush1.bf16.msra.mxu1 %v3756_v7  ;;  %1592 = vmatprep.subr.bf16.mxu0 %v3761_v8  ;;  %v3844_v7 = vld [vmem:[#allocation5 + $0x500] ss:$16 sps:$4 sm:$0xff]   ;;  %v3847_v8 = vld [vmem:[#allocation5 + $0x8] ss:$16 sps:$4 sm:$0xff]  }
  0x82   :  { %1635 = vmatprep.subr.bf16.mxu1 %v3764_v9  ;;  %1665 = vmatprep.mubr.bf16.mxu1 %v4362_v14  ;;  %v3855_v9 = vld [vmem:[#allocation5 + $0x1ec] ss:$16 sps:$4 sm:$0xff]  }
  0x83   :  { %1622 = vmatprep.mubr.bf16.mxu0 %v4431_v35 }
  0x84   :  { %1593 = vmatpush1.bf16.msra.mxu0 %v3759_v10  ;;  %v3858_v10 = vld [vmem:[#allocation5 + $0x2ec] ss:$16 sps:$4 sm:$0xff]  }
  0x85   :  { %1636 = vmatpush1.bf16.msra.mxu1 %v3762_v11  ;;  %1594 = vmatprep.subr.bf16.mxu0 %v3767_v12  ;;  %v4435_v11 = vld [vmem:[#allocation2 + $0x10] ss:$28 sps:$4 sm:$0xff]  }
  0x86   :  { %1637 = vmatprep.subr.bf16.mxu1 %v3770_v13  ;;  %v3853_v12 = vld [vmem:[#allocation5 + $0x1e8] ss:$16 sps:$4 sm:$0xff]  }
  0x87   :  { %v3856_v13 = vld [vmem:[#allocation5 + $0x2e8] ss:$16 sps:$4 sm:$0xff]  }
  0x88   :  { %1595 = vmatpush1.bf16.msra.mxu0 %v3765_v15  ;;  %v3861_v15 = vld [vmem:[#allocation5 + $0x1cc] ss:$16 sps:$4 sm:$0xff]  }
  0x89   :  { %1638 = vmatpush1.bf16.msra.mxu1 %v3768_v16  ;;  %1596 = vmatprep.subr.bf16.mxu0 %v3773_v17  ;;  %v3864_v16 = vld [vmem:[#allocation5 + $0x2cc] ss:$16 sps:$4 sm:$0xff]   ;;  %v3859_v17 = vld [vmem:[#allocation5 + $0x1c8] ss:$16 sps:$4 sm:$0xff]  }
  0x8a   :  { %1639 = vmatprep.subr.bf16.mxu1 %v3776_v18  ;;  %v3862_v18 = vld [vmem:[#allocation5 + $0x2c8] ss:$16 sps:$4 sm:$0xff]  }
  0x8c   :  { %1597 = vmatpush1.bf16.msra.mxu0 %v3771_v19  ;;  %v3867_v19 = vld [vmem:[#allocation5 + $0x1ac] ss:$16 sps:$4 sm:$0xff]  }
  0x8d   :  { %1640 = vmatpush1.bf16.msra.mxu1 %v3774_v20  ;;  %1598 = vmatprep.subr.bf16.mxu0 %v3779_v21  ;;  %v3870_v20 = vld [vmem:[#allocation5 + $0x2ac] ss:$16 sps:$4 sm:$0xff]   ;;  %v3865_v21 = vld [vmem:[#allocation5 + $0x1a8] ss:$16 sps:$4 sm:$0xff]  }
  0x8e   :  { %1641 = vmatprep.subr.bf16.mxu1 %v3782_v22  ;;  %v3868_v22 = vld [vmem:[#allocation5 + $0x2a8] ss:$16 sps:$4 sm:$0xff]  }
  0x90   :  { %1599 = vmatpush1.bf16.msra.mxu0 %v3777_v23  ;;  %v3873_v23 = vld [vmem:[#allocation5 + $0x18c] ss:$16 sps:$4 sm:$0xff]  }
  0x91   :  { %1642 = vmatpush1.bf16.msra.mxu1 %v3780_v24  ;;  %1600 = vmatprep.subr.bf16.mxu0 %v3785_v25  ;;  %v3876_v24 = vld [vmem:[#allocation5 + $0x28c] ss:$16 sps:$4 sm:$0xff]   ;;  %v3871_v25 = vld [vmem:[#allocation5 + $0x188] ss:$16 sps:$4 sm:$0xff]  }
  0x92   :  { %1643 = vmatprep.subr.bf16.mxu1 %v3788_v26  ;;  %v3874_v26 = vld [vmem:[#allocation5 + $0x288] ss:$16 sps:$4 sm:$0xff]  }
  0x94   :  { %1601 = vmatpush1.bf16.msra.mxu0 %v3783_v27  ;;  %v3879_v27 = vld [vmem:[#allocation5 + $0x16c] ss:$16 sps:$4 sm:$0xff]  }
  0x95   :  { %1644 = vmatpush1.bf16.msra.mxu1 %v3786_v28  ;;  %1602 = vmatprep.subr.bf16.mxu0 %v3791_v29  ;;  %v3882_v28 = vld [vmem:[#allocation5 + $0x26c] ss:$16 sps:$4 sm:$0xff]   ;;  %v3877_v29 = vld [vmem:[#allocation5 + $0x168] ss:$16 sps:$4 sm:$0xff]  }
  0x96   :  { %1645 = vmatprep.subr.bf16.mxu1 %v3794_v30  ;;  %v3885_v30 = vld [vmem:[#allocation5 + $0x14c] ss:$16 sps:$4 sm:$0xff]  }
  0x98   :  { %1603 = vmatpush1.bf16.msra.mxu0 %v3789_v31  ;;  %v3888_v31 = vld [vmem:[#allocation5 + $0x24c] ss:$16 sps:$4 sm:$0xff]  }
  0x99   :  { %1646 = vmatpush1.bf16.msra.mxu1 %v3792_v32  ;;  %1604 = vmatprep.subr.bf16.mxu0 %v3797_v33  ;;  %v3883_v32 = vld [vmem:[#allocation5 + $0x148] ss:$16 sps:$4 sm:$0xff]  }
  0x9a   :  { %1647 = vmatprep.subr.bf16.mxu1 %v3800_v34  ;;  %v3886_v33 = vld [vmem:[#allocation5 + $0x248] ss:$16 sps:$4 sm:$0xff]   ;;  %v3891_v34 = vld [vmem:[#allocation5 + $0x12c] ss:$16 sps:$4 sm:$0xff]  }
  0x9c   :  { %1605 = vmatpush1.bf16.msra.mxu0 %v3795_v36  ;;  %v3894_v36 = vld [vmem:[#allocation5 + $0x22c] ss:$16 sps:$4 sm:$0xff]  }
  0x9d   :  { %1648 = vmatpush1.bf16.msra.mxu1 %v3798_v37  ;;  %1606 = vmatprep.subr.bf16.mxu0 %v3803_v38  ;;  %v3889_v37 = vld [vmem:[#allocation5 + $0x128] ss:$16 sps:$4 sm:$0xff]  }
  0x9e   :  { %1676 = vmatprep.subr.bf16.mxu1 %v3807_v39  ;;  %v3892_v38 = vld [vmem:[#allocation5 + $0x228] ss:$16 sps:$4 sm:$0xff]   ;;  %v3897_v39 = vld [vmem:[#allocation5 + $0x10c] ss:$16 sps:$4 sm:$0xff]  }
  0xa0   :  { %1666 = vmatmul.mubr.bf16.vlgmr.msra.gmra.mxu1 %v3804_v41  ;;  %1607 = vmatpush2.bf16.msra.mxu0 %v3801_v40  ;;  %v3900_v40 = vld [vmem:[#allocation5 + $0x20c] ss:$16 sps:$4 sm:$0xff]   ;;  %v3895_v41 = vld [vmem:[#allocation5 + $0x108] ss:$16 sps:$4 sm:$0xff]  }
  0xa1   :  { %1677 = vmatpush1.bf16.msra.mxu1 %v3805_v42  ;;  %1608 = vmatprep.subr.bf16.mxu0 %v3810_v43  ;;  %v3898_v42 = vld [vmem:[#allocation5 + $0x208] ss:$16 sps:$4 sm:$0xff]   ;;  %v3903_v43 = vld [vmem:[#allocation5 + $0x3ec] ss:$16 sps:$4 sm:$0xff]  }
  0xa2   :  { %1678 = vmatprep.subr.bf16.mxu1 %v3813_v44  ;;  %1708 = vmatprep.mubr.bf16.mxu1 %v4421_v49  ;;  %v3829_v49 = vld [vmem:[#allocation5 + $0x68] ss:$16 sps:$4 sm:$0xff]   ;;  %v3906_v44 = vld [vmem:[#allocation5 + $0x4ec] ss:$16 sps:$4 sm:$0xff]  }
  0xa4   :  { %1609 = vmatpush2.bf16.msra.mxu0 %v3808_v45  ;;  %v3901_v45 = vld [vmem:[#allocation5 + $0x3e8] ss:$16 sps:$4 sm:$0xff]  }
  0xa5   :  { %1679 = vmatpush1.bf16.msra.mxu1 %v3811_v46  ;;  %1610 = vmatprep.subr.bf16.mxu0 %v3816_v47  ;;  %v3904_v46 = vld [vmem:[#allocation5 + $0x4e8] ss:$16 sps:$4 sm:$0xff]   ;;  %v3909_v47 = vld [vmem:[#allocation5 + $0x3cc] ss:$16 sps:$4 sm:$0xff]  }
  0xa6   :  { %1680 = vmatprep.subr.bf16.mxu1 %v3819_v48  ;;  %v3912_v48 = vld [vmem:[#allocation5 + $0x4cc] ss:$16 sps:$4 sm:$0xff]  }
  0xa8   :  { %1611 = vmatpush2.bf16.msra.mxu0 %v3814_v50  ;;  %v3907_v50 = vld [vmem:[#allocation5 + $0x3c8] ss:$16 sps:$4 sm:$0xff]  }
  0xa9   :  { %1681 = vmatpush1.bf16.msra.mxu1 %v3817_v52  ;;  %1612 = vmatprep.subr.bf16.mxu0 %v3822_v53  ;;  %v3910_v52 = vld [vmem:[#allocation5 + $0x4c8] ss:$16 sps:$4 sm:$0xff]   ;;  %v3915_v53 = vld [vmem:[#allocation5 + $0x3ac] ss:$16 sps:$4 sm:$0xff]  }
  0xaa   :  { %1682 = vmatprep.subr.bf16.mxu1 %v3825_v54  ;;  %v3918_v54 = vld [vmem:[#allocation5 + $0x4ac] ss:$16 sps:$4 sm:$0xff]  }
  0xac   :  { %1613 = vmatpush2.bf16.msra.mxu0 %v3820_v55  ;;  %v3913_v55 = vld [vmem:[#allocation5 + $0x3a8] ss:$16 sps:$4 sm:$0xff]  }
  0xad   :  { %1683 = vmatpush1.bf16.msra.mxu1 %v3823_v56  ;;  %1614 = vmatprep.subr.bf16.mxu0 %v3828_v57  ;;  %v3916_v56 = vld [vmem:[#allocation5 + $0x4a8] ss:$16 sps:$4 sm:$0xff]   ;;  %v3921_v57 = vld [vmem:[#allocation5 + $0x38c] ss:$16 sps:$4 sm:$0xff]  }
  0xae   :  { %1684 = vmatprep.subr.bf16.mxu1 %v3831_v58  ;;  %v3924_v58 = vld [vmem:[#allocation5 + $0x48c] ss:$16 sps:$4 sm:$0xff]  }
  0xb0   :  { %1615 = vmatpush2.bf16.msra.mxu0 %v3826_v59  ;;  %v3919_v59 = vld [vmem:[#allocation5 + $0x388] ss:$16 sps:$4 sm:$0xff]  }
  0xb1   :  { %1685 = vmatpush1.bf16.msra.mxu1 %v3829_v49  ;;  %1616 = vmatprep.subr.bf16.mxu0 %v3834_v60  ;;  %v3927_v49 = vld [vmem:[#allocation5 + $0x36c] ss:$16 sps:$4 sm:$0xff]  }
  0xb2   :  { %1686 = vmatprep.subr.bf16.mxu1 %v3837_v61  ;;  %v3930_v60 = vld [vmem:[#allocation5 + $0x46c] ss:$16 sps:$4 sm:$0xff]   ;;  %v3925_v61 = vld [vmem:[#allocation5 + $0x368] ss:$16 sps:$4 sm:$0xff]  }
  0xb4   :  { %1617 = vmatpush2.bf16.msra.mxu0 %v3832_v62  ;;  %v3928_v62 = vld [vmem:[#allocation5 + $0x468] ss:$16 sps:$4 sm:$0xff]  }
  0xb5   :  { %1687 = vmatpush1.bf16.msra.mxu1 %v3835_v63  ;;  %1618 = vmatprep.subr.bf16.mxu0 %v3840_v0  ;;  %v3933_v63 = vld [vmem:[#allocation5 + $0x34c] ss:$16 sps:$4 sm:$0xff]  }
  0xb6   :  { %1688 = vmatprep.subr.bf16.mxu1 %v3843_v1  ;;  %v3936_v0 = vld [vmem:[#allocation5 + $0x44c] ss:$16 sps:$4 sm:$0xff]   ;;  %v3934_v1 = vld [vmem:[#allocation5 + $0x448] ss:$16 sps:$4 sm:$0xff]  }
  0xb8   :  { %1619 = vmatpush2.bf16.msra.mxu0 %v3838_v2  ;;  %v3939_v2 = vld [vmem:[#allocation5 + $0x32c] ss:$16 sps:$4 sm:$0xff]  }
  0xb9   :  { %1689 = vmatpush1.bf16.msra.mxu1 %v3841_v3  ;;  %1620 = vmatprep.subr.bf16.mxu0 %v3846_v5  ;;  %v3942_v3 = vld [vmem:[#allocation5 + $0x42c] ss:$16 sps:$4 sm:$0xff]   ;;  %v3937_v5 = vld [vmem:[#allocation5 + $0x328] ss:$16 sps:$4 sm:$0xff]  }
  0xba   :  { %1690 = vmatprep.subr.bf16.mxu1 %v3849_v6  ;;  %v3940_v6 = vld [vmem:[#allocation5 + $0x428] ss:$16 sps:$4 sm:$0xff]  }
  0xbc   :  { %1621 = vmatpush2.bf16.msra.mxu0 %v3844_v7  ;;  %v3945_v7 = vld [vmem:[#allocation5 + $0x30c] ss:$16 sps:$4 sm:$0xff]  }
  0xbd   :  { %1691 = vmatpush1.bf16.msra.mxu1 %v3847_v8  ;;  %1719 = vmatprep.subr.bf16.mxu0 %v3858_v10  ;;  %v3948_v8 = vld [vmem:[#allocation5 + $0x40c] ss:$16 sps:$4 sm:$0xff]   ;;  %v3946_v10 = vld [vmem:[#allocation5 + $0x408] ss:$16 sps:$4 sm:$0xff]  }
  0xbe   :  { %1692 = vmatprep.subr.bf16.mxu1 %v3855_v9  ;;  %v3943_v9 = vld [vmem:[#allocation5 + $0x308] ss:$16 sps:$4 sm:$0xff]  }
  0xbf   :  { %1623 = vmatmul.mubr.bf16.vlgmr.msra.gmra.mxu0 %v4435_v11 }
  0xc0   :  { %1720 = vmatpush1.bf16.msra.mxu0 %v3856_v13  ;;  %1751 = vmatprep.mubr.bf16.mxu0 %v4423_v51  ;;  %v3880_v51 = vld [vmem:[#allocation5 + $0x268] ss:$16 sps:$4 sm:$0xff]   ;;  %v3954_v13 = vld [vmem:[#allocation5 + $0x6ec] ss:$16 sps:$4 sm:$0xff]  }
  0xc1   :  { %1693 = vmatpush2.bf16.msra.mxu1 %v3853_v12  ;;  %1721 = vmatprep.subr.bf16.mxu0 %v3864_v16  ;;  %v3951_v12 = vld [vmem:[#allocation5 + $0x5ec] ss:$16 sps:$4 sm:$0xff]   ;;  %v3952_v16 = vld [vmem:[#allocation5 + $0x6e8] ss:$16 sps:$4 sm:$0xff]  }
  0xc2   :  { %1694 = vmatprep.subr.bf16.mxu1 %v3861_v15  ;;  %v3949_v15 = vld [vmem:[#allocation5 + $0x5e8] ss:$16 sps:$4 sm:$0xff]  }
  0xc4   :  { %1722 = vmatpush1.bf16.msra.mxu0 %v3862_v18  ;;  %v3960_v18 = vld [vmem:[#allocation5 + $0x6cc] ss:$16 sps:$4 sm:$0xff]  }
  0xc5   :  { %1695 = vmatpush2.bf16.msra.mxu1 %v3859_v17  ;;  %1723 = vmatprep.subr.bf16.mxu0 %v3870_v20  ;;  %v3957_v17 = vld [vmem:[#allocation5 + $0x5cc] ss:$16 sps:$4 sm:$0xff]   ;;  %v3958_v20 = vld [vmem:[#allocation5 + $0x6c8] ss:$16 sps:$4 sm:$0xff]  }
  0xc6   :  { %1696 = vmatprep.subr.bf16.mxu1 %v3867_v19  ;;  %v3955_v19 = vld [vmem:[#allocation5 + $0x5c8] ss:$16 sps:$4 sm:$0xff]  }
  0xc8   :  { %1724 = vmatpush1.bf16.msra.mxu0 %v3868_v22  ;;  %v3963_v22 = vld [vmem:[#allocation5 + $0x5ac] ss:$16 sps:$4 sm:$0xff]  }
  0xc9   :  { %1697 = vmatpush2.bf16.msra.mxu1 %v3865_v21  ;;  %1725 = vmatprep.subr.bf16.mxu0 %v3876_v24  ;;  %v4221_v21 = vld [vmem:[#allocation2 + $0x8] ss:$28 sps:$4 sm:$0xff]   ;;  %v3961_v24 = vld [vmem:[#allocation5 + $0x5a8] ss:$16 sps:$4 sm:$0xff]  }
  0xca   :  { %1698 = vmatprep.subr.bf16.mxu1 %v3873_v23  ;;  %v3966_v23 = vld [vmem:[#allocation5 + $0x6ac] ss:$16 sps:$4 sm:$0xff]  }
  0xcc   :  { %1726 = vmatpush1.bf16.msra.mxu0 %v3874_v26  ;;  %v3969_v26 = vld [vmem:[#allocation5 + $0x58c] ss:$16 sps:$4 sm:$0xff]  }
  0xcd   :  { %1699 = vmatpush2.bf16.msra.mxu1 %v3871_v25  ;;  %1727 = vmatprep.subr.bf16.mxu0 %v3882_v28  ;;  %v3964_v25 = vld [vmem:[#allocation5 + $0x6a8] ss:$16 sps:$4 sm:$0xff]  }
  0xce   :  { %1700 = vmatprep.subr.bf16.mxu1 %v3879_v27  ;;  %v3972_v27 = vld [vmem:[#allocation5 + $0x68c] ss:$16 sps:$4 sm:$0xff]   ;;  %v3967_v28 = vld [vmem:[#allocation5 + $0x588] ss:$16 sps:$4 sm:$0xff]  }
  0xd0   :  { %1728 = vmatpush1.bf16.msra.mxu0 %v3880_v51  ;;  %v3975_v51 = vld [vmem:[#allocation5 + $0x56c] ss:$16 sps:$4 sm:$0xff]  }
  0xd1   :  { %1701 = vmatpush2.bf16.msra.mxu1 %v3877_v29  ;;  %1729 = vmatprep.subr.bf16.mxu0 %v3888_v31  ;;  %v3970_v29 = vld [vmem:[#allocation5 + $0x688] ss:$16 sps:$4 sm:$0xff]  }
  0xd2   :  { %1702 = vmatprep.subr.bf16.mxu1 %v3885_v30  ;;  %v3978_v30 = vld [vmem:[#allocation5 + $0x66c] ss:$16 sps:$4 sm:$0xff]   ;;  %v3973_v31 = vld [vmem:[#allocation5 + $0x568] ss:$16 sps:$4 sm:$0xff]  }
  0xd4   :  { %1730 = vmatpush1.bf16.msra.mxu0 %v3886_v33  ;;  %v3981_v33 = vld [vmem:[#allocation5 + $0x54c] ss:$16 sps:$4 sm:$0xff]  }
  0xd5   :  { %1703 = vmatpush2.bf16.msra.mxu1 %v3883_v32  ;;  %1731 = vmatprep.subr.bf16.mxu0 %v3894_v36  ;;  %v3976_v32 = vld [vmem:[#allocation5 + $0x668] ss:$16 sps:$4 sm:$0xff]  }
  0xd6   :  { %1704 = vmatprep.subr.bf16.mxu1 %v3891_v34  ;;  %v3979_v34 = vld [vmem:[#allocation5 + $0x548] ss:$16 sps:$4 sm:$0xff]  }
  0xd7   :  { %v3982_v36 = vld [vmem:[#allocation5 + $0x648] ss:$16 sps:$4 sm:$0xff]  }
  0xd8   :  { %1732 = vmatpush1.bf16.msra.mxu0 %v3892_v38  ;;  %v3990_v38 = vld [vmem:[#allocation5 + $0x62c] ss:$16 sps:$4 sm:$0xff]  }
  0xd9   :  { %1705 = vmatpush2.bf16.msra.mxu1 %v3889_v37  ;;  %1733 = vmatprep.subr.bf16.mxu0 %v3900_v40  ;;  %v3987_v37 = vld [vmem:[#allocation5 + $0x52c] ss:$16 sps:$4 sm:$0xff]   ;;  %v3988_v40 = vld [vmem:[#allocation5 + $0x628] ss:$16 sps:$4 sm:$0xff]  }
  0xda   :  { %1706 = vmatprep.subr.bf16.mxu1 %v3897_v39  ;;  %v3985_v39 = vld [vmem:[#allocation5 + $0x528] ss:$16 sps:$4 sm:$0xff]  }
  0xdc   :  { %1734 = vmatpush1.bf16.msra.mxu0 %v3898_v42  ;;  %v3996_v42 = vld [vmem:[#allocation5 + $0x60c] ss:$16 sps:$4 sm:$0xff]  }
  0xdd   :  { %1707 = vmatpush2.bf16.msra.mxu1 %v3895_v41  ;;  %1735 = vmatprep.subr.bf16.mxu0 %v3903_v43  ;;  %v3993_v41 = vld [vmem:[#allocation5 + $0x50c] ss:$16 sps:$4 sm:$0xff]   ;;  %v3991_v43 = vld [vmem:[#allocation5 + $0x508] ss:$16 sps:$4 sm:$0xff]  }
  0xde   :  { %1762 = vmatprep.subr.bf16.mxu1 %v3906_v44  ;;  %v3994_v44 = vld [vmem:[#allocation5 + $0x608] ss:$16 sps:$4 sm:$0xff]  }
  0xe0   :  { %1709 = vmatmul.mubr.bf16.vlgmr.msra.gmra.mxu1 %v4427_v4  ;;  %1736 = vmatpush2.bf16.msra.mxu0 %v3901_v45  ;;  %v3922_v4 = vld [vmem:[#allocation5 + $0x488] ss:$16 sps:$4 sm:$0xff]  }
  0xe1   :  { %1763 = vmatpush1.bf16.msra.mxu1 %v3904_v46  ;;  %1737 = vmatprep.subr.bf16.mxu0 %v3909_v47  ;;  %v3999_v45 = vld [vmem:[#allocation8 + $0xe4] ss:$16 sps:$4 sm:$0xff]   ;;  %v3997_v46 = vld [vmem:[#allocation8 + $0xe0] ss:$16 sps:$4 sm:$0xff]  }
  0xe2   :  { %1764 = vmatprep.subr.bf16.mxu1 %v3912_v48  ;;  %1794 = vmatprep.mubr.bf16.mxu1 %v4431_v35  ;;  %v3931_v35 = vld [vmem:[#allocation5 + $0x348] ss:$16 sps:$4 sm:$0xff]   ;;  %v4222_v48 = vld [vmem:[#allocation2 + $0x18] ss:$28 sps:$4 sm:$0xff]  }
  0xe3   :  { %v4002_v47 = vld [vmem:[#allocation8 + $0xc4] ss:$16 sps:$4 sm:$0xff]  }
  0xe4   :  { %1738 = vmatpush2.bf16.msra.mxu0 %v3907_v50  ;;  %v4000_v50 = vld [vmem:[#allocation8 + $0xc0] ss:$16 sps:$4 sm:$0xff]  }
  0xe5   :  { %1765 = vmatpush1.bf16.msra.mxu1 %v3910_v52  ;;  %1739 = vmatprep.subr.bf16.mxu0 %v3915_v53  ;;  %v4005_v52 = vld [vmem:[#allocation8 + $0xa4] ss:$16 sps:$4 sm:$0xff]   ;;  %v4003_v53 = vld [vmem:[#allocation8 + $0xa0] ss:$16 sps:$4 sm:$0xff]  }
  0xe6   :  { %1766 = vmatprep.subr.bf16.mxu1 %v3918_v54  ;;  %v4008_v54 = vld [vmem:[#allocation8 + $0x84] ss:$16 sps:$4 sm:$0xff]  }
  0xe8   :  { %1740 = vmatpush2.bf16.msra.mxu0 %v3913_v55  ;;  %v4006_v55 = vld [vmem:[#allocation8 + $0x80] ss:$16 sps:$4 sm:$0xff]  }
  0xe9   :  { %1767 = vmatpush1.bf16.msra.mxu1 %v3916_v56  ;;  %1741 = vmatprep.subr.bf16.mxu0 %v3921_v57  ;;  %v4011_v56 = vld [vmem:[#allocation8 + $0x64] ss:$16 sps:$4 sm:$0xff]   ;;  %v4009_v57 = vld [vmem:[#allocation8 + $0x60] ss:$16 sps:$4 sm:$0xff]  }
  0xea   :  { %1768 = vmatprep.subr.bf16.mxu1 %v3924_v58  ;;  %v4069_v58 = vld [vmem:[#allocation8 + $0x2e0] ss:$16 sps:$4 sm:$0xff]  }
  0xec   :  { %1742 = vmatpush2.bf16.msra.mxu0 %v3919_v59  ;;  %v4071_v59 = vld [vmem:[#allocation8 + $0x2e4] ss:$16 sps:$4 sm:$0xff]  }
  0xed   :  { %1769 = vmatpush1.bf16.msra.mxu1 %v3922_v4  ;;  %1743 = vmatprep.subr.bf16.mxu0 %v3927_v49  ;;  %v4012_v4 = vld [vmem:[#allocation8 + $0x40] ss:$16 sps:$4 sm:$0xff]  }
  0xee   :  { %1770 = vmatprep.subr.bf16.mxu1 %v3930_v60  ;;  %v4075_v49 = vld [vmem:[#allocation8 + $0x2c0] ss:$16 sps:$4 sm:$0xff]   ;;  %v4077_v60 = vld [vmem:[#allocation8 + $0x2c4] ss:$16 sps:$4 sm:$0xff]  }
  0xf0   :  { %1744 = vmatpush2.bf16.msra.mxu0 %v3925_v61  ;;  %v4017_v61 = vld [vmem:[#allocation8 + $0x24] ss:$16 sps:$4 sm:$0xff]  }
  0xf1   :  { %1771 = vmatpush1.bf16.msra.mxu1 %v3928_v62  ;;  %1745 = vmatprep.subr.bf16.mxu0 %v3933_v63  ;;  %v4015_v62 = vld [vmem:[#allocation8 + $0x20] ss:$16 sps:$4 sm:$0xff]  }
  0xf2   :  { %1772 = vmatprep.subr.bf16.mxu1 %v3936_v0  ;;  %v4081_v63 = vld [vmem:[#allocation8 + $0x2a0] ss:$16 sps:$4 sm:$0xff]   ;;  %v4083_v0 = vld [vmem:[#allocation8 + $0x2a4] ss:$16 sps:$4 sm:$0xff]  }
  0xf4   :  { %1746 = vmatpush2.bf16.msra.mxu0 %v3931_v35  ;;  %v4020_v35 = vld [vmem:[#allocation8 + $0x4] ss:$16 sps:$4 sm:$0xff]  }
  0xf5   :  { %1773 = vmatpush1.bf16.msra.mxu1 %v3934_v1  ;;  %1747 = vmatprep.subr.bf16.mxu0 %v3939_v2  ;;  %v4018_v1 = vld [vmem:[#allocation8] ss:$16 sps:$4 sm:$0xff]  }
  0xf6   :  { %1774 = vmatprep.subr.bf16.mxu1 %v3942_v3  ;;  %v4087_v2 = vld [vmem:[#allocation8 + $0x280] ss:$16 sps:$4 sm:$0xff]   ;;  %v4089_v3 = vld [vmem:[#allocation8 + $0x284] ss:$16 sps:$4 sm:$0xff]  }
  0xf8   :  { %1748 = vmatpush2.bf16.msra.mxu0 %v3937_v5  ;;  %v4023_v5 = vld [vmem:[#allocation8 + $0x1e4] ss:$16 sps:$4 sm:$0xff]  }
  0xf9   :  { %1775 = vmatpush1.bf16.msra.mxu1 %v3940_v6  ;;  %1749 = vmatprep.subr.bf16.mxu0 %v3945_v7  ;;  %v4021_v6 = vld [vmem:[#allocation8 + $0x1e0] ss:$16 sps:$4 sm:$0xff]  }
  0xfa   :  { %1776 = vmatprep.subr.bf16.mxu1 %v3948_v8  ;;  %v4093_v7 = vld [vmem:[#allocation8 + $0x260] ss:$16 sps:$4 sm:$0xff]   ;;  %v4095_v8 = vld [vmem:[#allocation8 + $0x264] ss:$16 sps:$4 sm:$0xff]  }
  0xfc   :  { %1750 = vmatpush2.bf16.msra.mxu0 %v3943_v9  ;;  %v4026_v9 = vld [vmem:[#allocation8 + $0x1c4] ss:$16 sps:$4 sm:$0xff]  }
  0xfd   :  { %1777 = vmatpush1.bf16.msra.mxu1 %v3946_v10  ;;  %1805 = vmatprep.subr.bf16.mxu0 %v3954_v13  ;;  %v4024_v10 = vld [vmem:[#allocation8 + $0x1c0] ss:$16 sps:$4 sm:$0xff]   ;;  %v4101_v13 = vld [vmem:[#allocation8 + $0x244] ss:$16 sps:$4 sm:$0xff]  }
  0xfe   :  { %1778 = vmatprep.subr.bf16.mxu1 %v3951_v12  ;;  %v4029_v12 = vld [vmem:[#allocation8 + $0x1a4] ss:$16 sps:$4 sm:$0xff]  }
  0xff   :  { %1752 = vmatmul.mubr.bf16.vlgmr.msra.gmra.mxu0 %v4221_v21  ;;  %v4111_v21 = vld [vmem:[#allocation8 + $0x200] ss:$16 sps:$4 sm:$0xff]  }
 0x100   :  { %1806 = vmatpush1.bf16.msra.mxu0 %v3952_v16  ;;  %1837 = vmatprep.mubr.bf16.mxu0 %v4362_v14  ;;  %v3984_v14 = vld [vmem:[#allocation5 + $0x64c] ss:$16 sps:$4 sm:$0xff]   ;;  %v4027_v16 = vld [vmem:[#allocation8 + $0x1a0] ss:$16 sps:$4 sm:$0xff]  }
 0x101   :  { %1779 = vmatpush2.bf16.msra.mxu1 %v3949_v15  ;;  %1807 = vmatprep.subr.bf16.mxu0 %v3960_v18  ;;  %v4099_v15 = vld [vmem:[#allocation8 + $0x240] ss:$16 sps:$4 sm:$0xff]   ;;  %v4107_v18 = vld [vmem:[#allocation8 + $0x224] ss:$16 sps:$4 sm:$0xff]  }
 0x102   :  { %1780 = vmatprep.subr.bf16.mxu1 %v3957_v17  ;;  %v4032_v17 = vld [vmem:[#allocation8 + $0x184] ss:$16 sps:$4 sm:$0xff]  }
 0x104   :  { %1808 = vmatpush1.bf16.msra.mxu0 %v3958_v20  ;;  %v4030_v20 = vld [vmem:[#allocation8 + $0x180] ss:$16 sps:$4 sm:$0xff]  }
 0x105   :  { %1781 = vmatpush2.bf16.msra.mxu1 %v3955_v19  ;;  %1809 = vmatprep.subr.bf16.mxu0 %v3966_v23  ;;  %v4105_v19 = vld [vmem:[#allocation8 + $0x220] ss:$16 sps:$4 sm:$0xff]   ;;  %v4035_v23 = vld [vmem:[#allocation8 + $0x164] ss:$16 sps:$4 sm:$0xff]  }
 0x106   :  { %1782 = vmatprep.subr.bf16.mxu1 %v3963_v22  ;;  %v4113_v22 = vld [vmem:[#allocation8 + $0x204] ss:$16 sps:$4 sm:$0xff]  }
 0x108   :  { %1810 = vmatpush1.bf16.msra.mxu0 %v3964_v25  ;;  %v4117_v25 = vld [vmem:[#allocation8 + $0x3e0] ss:$16 sps:$4 sm:$0xff]  }
 0x109   :  { %1783 = vmatpush2.bf16.msra.mxu1 %v3961_v24  ;;  %1811 = vmatprep.subr.bf16.mxu0 %v3972_v27  ;;  %v4033_v24 = vld [vmem:[#allocation8 + $0x160] ss:$16 sps:$4 sm:$0xff]   ;;  %v4038_v27 = vld [vmem:[#allocation8 + $0x144] ss:$16 sps:$4 sm:$0xff]  }
 0x10a   :  { %1784 = vmatprep.subr.bf16.mxu1 %v3969_v26  ;;  %v4119_v26 = vld [vmem:[#allocation8 + $0x3e4] ss:$16 sps:$4 sm:$0xff]  }
 0x10c   :  { %1812 = vmatpush1.bf16.msra.mxu0 %v3970_v29  ;;  %v4036_v29 = vld [vmem:[#allocation8 + $0x140] ss:$16 sps:$4 sm:$0xff]  }
 0x10d   :  { %1785 = vmatpush2.bf16.msra.mxu1 %v3967_v28  ;;  %1813 = vmatprep.subr.bf16.mxu0 %v3978_v30  ;;  %v4122_v28 = vld [vmem:[#allocation8 + $0x3c4] ss:$16 sps:$4 sm:$0xff]  }
 0x10e   :  { %1786 = vmatprep.subr.bf16.mxu1 %v3975_v51  ;;  %v4120_v51 = vld [vmem:[#allocation8 + $0x3c0] ss:$16 sps:$4 sm:$0xff]   ;;  %v4041_v30 = vld [vmem:[#allocation8 + $0x124] ss:$16 sps:$4 sm:$0xff]  }
 0x110   :  { %1814 = vmatpush1.bf16.msra.mxu0 %v3976_v32  ;;  %v4039_v32 = vld [vmem:[#allocation8 + $0x120] ss:$16 sps:$4 sm:$0xff]  }
 0x111   :  { %1787 = vmatpush2.bf16.msra.mxu1 %v3973_v31  ;;  %1815 = vmatprep.subr.bf16.mxu0 %v3984_v14  ;;  %v4125_v31 = vld [vmem:[#allocation8 + $0x3a4] ss:$16 sps:$4 sm:$0xff]  }
 0x112   :  { %1788 = vmatprep.subr.bf16.mxu1 %v3981_v33  ;;  %v4123_v33 = vld [vmem:[#allocation8 + $0x3a0] ss:$16 sps:$4 sm:$0xff]   ;;  %v4044_v14 = vld [vmem:[#allocation8 + $0x104] ss:$16 sps:$4 sm:$0xff]  }
 0x114   :  { %1816 = vmatpush1.bf16.msra.mxu0 %v3982_v36  ;;  %v4042_v36 = vld [vmem:[#allocation8 + $0x100] ss:$16 sps:$4 sm:$0xff]  }
 0x115   :  { %1789 = vmatpush2.bf16.msra.mxu1 %v3979_v34  ;;  %1817 = vmatprep.subr.bf16.mxu0 %v3990_v38  ;;  %v4128_v34 = vld [vmem:[#allocation8 + $0x384] ss:$16 sps:$4 sm:$0xff]   ;;  %v4047_v38 = vld [vmem:[#allocation8 + $0xec] ss:$16 sps:$4 sm:$0xff]  }
 0x116   :  { %1790 = vmatprep.subr.bf16.mxu1 %v3987_v37  ;;  %v4126_v37 = vld [vmem:[#allocation8 + $0x380] ss:$16 sps:$4 sm:$0xff]  }
 0x118   :  { %1818 = vmatpush1.bf16.msra.mxu0 %v3988_v40  ;;  %v4129_v40 = vld [vmem:[#allocation8 + $0x360] ss:$16 sps:$4 sm:$0xff]  }
 0x119   :  { %1791 = vmatpush2.bf16.msra.mxu1 %v3985_v39  ;;  %1819 = vmatprep.subr.bf16.mxu0 %v3996_v42  ;;  %v4131_v39 = vld [vmem:[#allocation8 + $0x364] ss:$16 sps:$4 sm:$0xff]   ;;  %v4132_v42 = vld [vmem:[#allocation8 + $0x340] ss:$16 sps:$4 sm:$0xff]  }
 0x11a   :  { %1792 = vmatprep.subr.bf16.mxu1 %v3993_v41  ;;  %v4134_v41 = vld [vmem:[#allocation8 + $0x344] ss:$16 sps:$4 sm:$0xff]  }
 0x11c   :  { %1820 = vmatpush1.bf16.msra.mxu0 %v3994_v44  ;;  %v4135_v44 = vld [vmem:[#allocation8 + $0x320] ss:$16 sps:$4 sm:$0xff]  }
 0x11d   :  { %1793 = vmatpush2.bf16.msra.mxu1 %v3991_v43  ;;  %2650 = vmatprep.subr.bf16.mxu0 %v3999_v45  ;;  %v4137_v43 = vld [vmem:[#allocation8 + $0x324] ss:$16 sps:$4 sm:$0xff]  }
 0x11e   :  { %2693 = vmatprep.subr.bf16.mxu1 %v4071_v59  ;;  %v4140_v45 = vld [vmem:[#allocation8 + $0x304] ss:$16 sps:$4 sm:$0xff]   ;;  %v4447_v59 = vld [vmem:[#allocation7] sm:$0xf] }
 0x11f   :  { %1838 = vmatmul.mubr.bf16.vlgmr.msra.gmra.mxu0 %v4222_v48 }
 0x120   :  { %1795 = vmatmul.mubr.bf16.vlgmr.msra.gmra.mxu1 %v4435_v11  ;;  %2651 = vmatpush1.bf16.msra.mxu0 %v3997_v46  ;;  %v4014_v11 = vld [vmem:[#allocation8 + $0x44] ss:$16 sps:$4 sm:$0xff]   ;;  %v4138_v46 = vld [vmem:[#allocation8 + $0x300] ss:$16 sps:$4 sm:$0xff]  }
 0x121   :  { %2652 = vmatprep.subr.bf16.mxu0 %v4002_v47  ;;  %2694 = vmatpush1.bf16.msra.mxu1 %v4069_v58  ;;  %v328_v47 = vlaneseq }
 0x122   :  { %2695 = vmatprep.subr.bf16.mxu1 %v4077_v60 }
 0x124   :  { %2653 = vmatpush1.bf16.msra.mxu0 %v4000_v50  ;;  %v4143_v50 = vld [vmem:[#allocation8 + $0x2ec] ss:$16 sps:$4 sm:$0xff]  }
 0x125   :  { %2654 = vmatprep.subr.bf16.mxu0 %v4005_v52  ;;  %2696 = vmatpush1.bf16.msra.mxu1 %v4075_v49  ;;  %v4443_v52 = vshrl.u32 %v328_v47, 7  ;;  %v4078_v47 = vld [vmem:[#allocation8 + $0x1c8] ss:$16 sps:$4 sm:$0xff]  }
 0x126   :  { %2697 = vmatprep.subr.bf16.mxu1 %v4083_v0 }
 0x128   :  { %2655 = vmatpush1.bf16.msra.mxu0 %v4003_v53 }
 0x129   :  { %2656 = vmatprep.subr.bf16.mxu0 %v4008_v54  ;;  %2698 = vmatpush1.bf16.msra.mxu1 %v4081_v63 }
 0x12a   :  { %2699 = vmatprep.subr.bf16.mxu1 %v4089_v3 }
 0x12c   :  { %2657 = vmatpush1.bf16.msra.mxu0 %v4006_v55  ;;  %v334_v55 = vsub.s32 1, %v4443_v52 }
 0x12d   :  { %2658 = vmatprep.subr.bf16.mxu0 %v4011_v56  ;;  %2700 = vmatpush1.bf16.msra.mxu1 %v4087_v2  ;;  %v330_v56 = vsub.s32 0, %v4443_v52 }
 0x12e   :  { %2701 = vmatprep.subr.bf16.mxu1 %v4095_v8 }
 0x130   :  { %2659 = vmatpush1.bf16.msra.mxu0 %v4009_v57 }
 0x131   :  { %2660 = vmatprep.subr.bf16.mxu0 %v4014_v11  ;;  %2702 = vmatpush1.bf16.msra.mxu1 %v4093_v7  ;;  %v335_v11 = vrot.slane %v4447_v59, %v334_v55 }
 0x132   :  { %2703 = vmatprep.subr.bf16.mxu1 %v4101_v13 }
 0x134   :  { %2661 = vmatpush1.bf16.msra.mxu0 %v4012_v4  ;;  %v331_v4 = vrot.slane %v4447_v59, %v330_v56 }
 0x135   :  { %2662 = vmatprep.subr.bf16.mxu0 %v4017_v61  ;;  %2704 = vmatpush1.bf16.msra.mxu1 %v4099_v15 }
 0x136   :  { %2705 = vmatprep.subr.bf16.mxu1 %v4107_v18 }
 0x138   :  { %2663 = vmatpush1.bf16.msra.mxu0 %v4015_v62 }
 0x139   :  { %2664 = vmatprep.subr.bf16.mxu0 %v4020_v35  ;;  %2706 = vmatpush1.bf16.msra.mxu1 %v4105_v19 }
 0x13a   :  { %2707 = vmatprep.subr.bf16.mxu1 %v4113_v22 }
 0x13c   :  { %2665 = vmatpush1.bf16.msra.mxu0 %v4018_v1 }
 0x13d   :  { %2666 = vmatprep.subr.bf16.mxu0 %v4023_v5  ;;  %2708 = vmatpush1.bf16.msra.mxu1 %v4111_v21 }
 0x13e   :  { %2709 = vmatprep.subr.bf16.mxu1 %v4119_v26 }
 0x13f   :  { %v1538_v53 = vpop.f32.mrf.mxu0 }
 0x140   :  { %2667 = vmatpush2.bf16.msra.mxu0 %v4021_v6  ;;  %v1581_v48 = vpop.f32.mrf.mxu1  ;;  %v1539_v63 = vadd.f32 %v1538_v53, %v331_v4  ;;  %v4092_v53 = vld [vmem:[#allocation8 + $0x18c] ss:$16 sps:$4 sm:$0xff]  }
 0x141   :  { %2668 = vmatprep.subr.bf16.mxu0 %v4026_v9  ;;  %2710 = vmatpush2.bf16.msra.mxu1 %v4117_v25  ;;  %v1540_v57 = vpop.f32.mrf.mxu0 }
 0x142   :  { %2711 = vmatprep.subr.bf16.mxu1 %v4122_v28  ;;  %v1583_v54 = vpop.f32.mrf.mxu1  ;;  %v1541_v62 = vadd.f32 %v1540_v57, %v335_v11  ;;  %v1582_v6 = vadd.f32 %v1581_v48, %v1539_v63  ;;  %v4086_v48 = vld [vmem:[#allocation8 + $0x1ac] ss:$16 sps:$4 sm:$0xff]  }
 0x143   :  { %v1542_v49 = vpop.f32.mrf.mxu0  ;;  %v4098_v57 = vld [vmem:[#allocation8 + $0x16c] ss:$16 sps:$4 sm:$0xff]  }
 0x144   :  { %2669 = vmatpush2.bf16.msra.mxu0 %v4024_v10  ;;  %v1585_v58 = vpop.f32.mrf.mxu1  ;;  %v1543_v35 = vadd.f32 %v1542_v49, %v331_v4  ;;  %v1584_v3 = vadd.f32 %v1583_v54, %v1541_v62  ;;  %v4090_v54 = vld [vmem:[#allocation8 + $0x188] ss:$16 sps:$4 sm:$0xff]   ;;  %v4110_v49 = vld [vmem:[#allocation8 + $0x12c] ss:$16 sps:$4 sm:$0xff]  }
 0x145   :  { %2670 = vmatprep.subr.bf16.mxu0 %v4029_v12  ;;  %2712 = vmatpush2.bf16.msra.mxu1 %v4120_v51  ;;  %v1544_v0 = vpop.f32.mrf.mxu0  ;;  %v4102_v4 = vld [vmem:[#allocation8 + $0x148] ss:$16 sps:$4 sm:$0xff]  }
 0x146   :  { %2713 = vmatprep.subr.bf16.mxu1 %v4125_v31  ;;  %v1587_v60 = vpop.f32.mrf.mxu1  ;;  %v1545_v5 = vadd.f32 %v1544_v0, %v335_v11  ;;  %v1586_v8 = vadd.f32 %v1585_v58, %v1543_v35  ;;  %v4048_v31 = vld [vmem:[#allocation8 + $0xc8] ss:$16 sps:$4 sm:$0xff]   ;;  %v4104_v11 = vld [vmem:[#allocation8 + $0x14c] ss:$16 sps:$4 sm:$0xff]  }
 0x147   :  { %v4096_v58 = vld [vmem:[#allocation8 + $0x168] ss:$16 sps:$4 sm:$0xff]  }
 0x148   :  { %2671 = vmatpush2.bf16.msra.mxu0 %v4027_v16  ;;  %v1588_v15 = vadd.f32 %v1587_v60, %v1545_v5  ;;  %v4108_v60 = vld [vmem:[#allocation8 + $0x128] ss:$16 sps:$4 sm:$0xff]  }
 0x149   :  { %2672 = vmatprep.subr.bf16.mxu0 %v4032_v17  ;;  %2714 = vmatpush2.bf16.msra.mxu1 %v4123_v33  ;;  %v4051_v33 = vld [vmem:[#allocation8 + $0xa8] ss:$16 sps:$4 sm:$0xff]  }
 0x14a   :  { %2715 = vmatprep.subr.bf16.mxu1 %v4128_v34  ;;  %v4054_v34 = vld [vmem:[#allocation8 + $0x88] ss:$16 sps:$4 sm:$0xff]  }
 0x14b   :  { %v4114_v62 = vld [vmem:[#allocation8 + $0x108] ss:$16 sps:$4 sm:$0xff]  }
 0x14c   :  { %2673 = vmatpush2.bf16.msra.mxu0 %v4030_v20 }
 0x14d   :  { %2674 = vmatprep.subr.bf16.mxu0 %v4035_v23  ;;  %2716 = vmatpush2.bf16.msra.mxu1 %v4126_v37  ;;  %v4057_v37 = vld [vmem:[#allocation8 + $0x68] ss:$16 sps:$4 sm:$0xff]  }
 0x14e   :  { %2717 = vmatprep.subr.bf16.mxu1 %v4131_v39  ;;  %v4060_v39 = vld [vmem:[#allocation8 + $0x48] ss:$16 sps:$4 sm:$0xff]  }
 0x150   :  { %2675 = vmatpush2.bf16.msra.mxu0 %v4033_v24 }
 0x151   :  { %2676 = vmatprep.subr.bf16.mxu0 %v4038_v27  ;;  %2718 = vmatpush2.bf16.msra.mxu1 %v4129_v40  ;;  %v4065_v40 = vld [vmem:[#allocation8 + $0x2c] ss:$16 sps:$4 sm:$0xff]  }
 0x152   :  { %2719 = vmatprep.subr.bf16.mxu1 %v4134_v41  ;;  %v4063_v41 = vld [vmem:[#allocation8 + $0x28] ss:$16 sps:$4 sm:$0xff]  }
 0x154   :  { %2677 = vmatpush2.bf16.msra.mxu0 %v4036_v29  ;;  %v4045_v29 = vld [vmem:[#allocation8 + $0xe8] ss:$16 sps:$4 sm:$0xff]  }
 0x155   :  { %2678 = vmatprep.subr.bf16.mxu0 %v4041_v30  ;;  %2720 = vmatpush2.bf16.msra.mxu1 %v4132_v42  ;;  %v4050_v30 = vld [vmem:[#allocation8 + $0xcc] ss:$16 sps:$4 sm:$0xff]  }
 0x156   :  { %2721 = vmatprep.subr.bf16.mxu1 %v4137_v43  ;;  %v4068_v42 = vld [vmem:[#allocation8 + $0xc] ss:$16 sps:$4 sm:$0xff]   ;;  %v4066_v43 = vld [vmem:[#allocation8 + $0x8] ss:$16 sps:$4 sm:$0xff]  }
 0x158   :  { %2679 = vmatpush2.bf16.msra.mxu0 %v4039_v32  ;;  %v4053_v32 = vld [vmem:[#allocation8 + $0xac] ss:$16 sps:$4 sm:$0xff]  }
 0x159   :  { %2680 = vmatprep.subr.bf16.mxu0 %v4044_v14  ;;  %2722 = vmatpush2.bf16.msra.mxu1 %v4135_v44  ;;  %v4056_v14 = vld [vmem:[#allocation8 + $0x8c] ss:$16 sps:$4 sm:$0xff]  }
 0x15a   :  { %2723 = vmatprep.subr.bf16.mxu1 %v4140_v45  ;;  %v4074_v44 = vld [vmem:[#allocation8 + $0x1ec] ss:$16 sps:$4 sm:$0xff]   ;;  %v4072_v45 = vld [vmem:[#allocation8 + $0x1e8] ss:$16 sps:$4 sm:$0xff]  }
 0x15c   :  { %2681 = vmatpush2.bf16.msra.mxu0 %v4042_v36  ;;  %v4059_v36 = vld [vmem:[#allocation8 + $0x6c] ss:$16 sps:$4 sm:$0xff]  }
 0x15d   :  { %2736 = vmatprep.subr.bf16.mxu0 %v4047_v38  ;;  %2724 = vmatpush2.bf16.msra.mxu1 %v4138_v46  ;;  %v4062_v38 = vld [vmem:[#allocation8 + $0x4c] ss:$16 sps:$4 sm:$0xff]  }
 0x15e   :  { %2779 = vmatprep.subr.bf16.mxu1 %v4143_v50  ;;  %v4080_v46 = vld [vmem:[#allocation8 + $0x1cc] ss:$16 sps:$4 sm:$0xff]   ;;  %v4084_v50 = vld [vmem:[#allocation8 + $0x1a8] ss:$16 sps:$4 sm:$0xff]  }
 0x160   :  { %v1667_v61 = vpop.f32.mrf.mxu1 }
 0x162   :  { %v1669_v1 = vpop.f32.mrf.mxu1 }
 0x164   :  { %v1671_v10 = vpop.f32.mrf.mxu1 }
 0x166   :  { %v1673_v21 = vpop.f32.mrf.mxu1 }
 0x17f   :  { %v1624_v2 = vpop.f32.mrf.mxu0 }
 0x180   :  { %v1625_v12 = vadd.f32 %v1624_v2, %v1582_v6  ;;  %v342_v2 = vsub.s32 3, %v4443_v52 }
 0x181   :  { %v1626_v7 = vpop.f32.mrf.mxu0 }
 0x182   :  { %v1627_v9 = vadd.f32 %v1626_v7, %v1584_v3  ;;  %v1668_v22 = vadd.f32 %v1667_v61, %v1625_v12  ;;  %v4116_v61 = vld [vmem:[#allocation8 + $0x10c] ss:$16 sps:$4 sm:$0xff]   ;;  %v338_v3 = vsub.s32 2, %v4443_v52  ;;  %v343_v7 = vrot.slane %v4447_v59, %v342_v2 }
 0x183   :  { %v1628_v13 = vpop.f32.mrf.mxu0 }
 0x184   :  { %v1629_v16 = vadd.f32 %v1628_v13, %v1586_v8  ;;  %v1670_v18 = vadd.f32 %v1669_v1, %v1627_v9  ;;  %v1848_v27 = vmax.f32 %v1668_v22, 0.0  ;;  %v339_v8 = vrot.slane %v4447_v59, %v338_v3 }
 0x185   :  { %v1630_v17 = vpop.f32.mrf.mxu0 }
 0x186   :  { %v1672_v19 = vadd.f32 %v1671_v10, %v1629_v16  ;;  %v1631_v20 = vadd.f32 %v1630_v17, %v1588_v15  ;;  %v1849_v25 = vmax.f32 %v1670_v18, 0.0 }
 0x188   :  { %v1674_v23 = vadd.f32 %v1673_v21, %v1631_v20  ;;  %v1852_v24 = vmax.f32 %v1672_v19, 0.0 }
 0x18a   :  { %v1853_v26 = vmax.f32 %v1674_v23, 0.0  ;;  %v4455_v51 = vpack.c.bf16 %v1852_v24, %v1848_v27 }
 0x18c   :  { %v1857_v28 = vpack.c.bf16 %v1853_v26, %v1849_v25 }
 0x18e   :  { %2682 = vmatprep.mubr.bf16.mxu0 %v1857_v28 }
 0x18f   :  { %2683 = vmatmul.mubr.bf16.vlgmr.msra.gmra.mxu0 %v4455_v51 }
 0x190   :  { %2737 = vmatpush1.bf16.msra.mxu0 %v4045_v29  ;;  %2768 = vmatprep.mubr.bf16.mxu0 %v1857_v28 }
 0x191   :  { %2738 = vmatprep.subr.bf16.mxu0 %v4050_v30 }
 0x194   :  { %2739 = vmatpush1.bf16.msra.mxu0 %v4048_v31 }
 0x195   :  { %2740 = vmatprep.subr.bf16.mxu0 %v4053_v32 }
 0x198   :  { %2741 = vmatpush1.bf16.msra.mxu0 %v4051_v33 }
 0x199   :  { %2742 = vmatprep.subr.bf16.mxu0 %v4056_v14 }
 0x19c   :  { %2743 = vmatpush1.bf16.msra.mxu0 %v4054_v34 }
 0x19d   :  { %2744 = vmatprep.subr.bf16.mxu0 %v4059_v36 }
 0x1a0   :  { %2745 = vmatpush1.bf16.msra.mxu0 %v4057_v37  ;;  %v1710_v63 = vpop.f32.mrf.mxu1 }
 0x1a1   :  { %2746 = vmatprep.subr.bf16.mxu0 %v4062_v38  ;;  %v1711_v13 = vadd.f32 %v1710_v63, %v339_v8  ;;  %v4173_v63 = vld [vmem:[#allocation8 + $0x3ac] ss:$16 sps:$4 sm:$0xff]  }
 0x1a2   :  { %v1712_v35 = vpop.f32.mrf.mxu1 }
 0x1a3   :  { %v1713_v12 = vadd.f32 %v1712_v35, %v343_v7  ;;  %v4176_v35 = vld [vmem:[#allocation8 + $0x38c] ss:$16 sps:$4 sm:$0xff]  }
 0x1a4   :  { %2747 = vmatpush1.bf16.msra.mxu0 %v4060_v39  ;;  %v1714_v5 = vpop.f32.mrf.mxu1 }
 0x1a5   :  { %2748 = vmatprep.subr.bf16.mxu0 %v4065_v40  ;;  %v1715_v17 = vadd.f32 %v1714_v5, %v339_v8  ;;  %v4141_v40 = vld [vmem:[#allocation8 + $0x2e8] ss:$16 sps:$4 sm:$0xff]   ;;  %v4179_v8 = vld [vmem:[#allocation8 + $0x36c] ss:$16 sps:$4 sm:$0xff]  }
 0x1a6   :  { %v1716_v9 = vpop.f32.mrf.mxu1  ;;  %v4190_v5 = vld [vmem:[#allocation10 + $0x38] sm:$0xff]  }
 0x1a7   :  { %v1717_v22 = vadd.f32 %v1716_v9, %v343_v7  ;;  %v4174_v7 = vld [vmem:[#allocation8 + $0x388] ss:$16 sps:$4 sm:$0xff]   ;;  %v4192_v9 = vld [vmem:[#allocation10 + $0x30] sm:$0xff]  }
 0x1a8   :  { %2749 = vmatpush1.bf16.msra.mxu0 %v4063_v41 }
 0x1a9   :  { %2750 = vmatprep.subr.bf16.mxu0 %v4068_v42  ;;  %v4146_v42 = vld [vmem:[#allocation8 + $0x2cc] ss:$16 sps:$4 sm:$0xff]  }
 0x1ac   :  { %2751 = vmatpush1.bf16.msra.mxu0 %v4066_v43  ;;  %v4144_v43 = vld [vmem:[#allocation8 + $0x2c8] ss:$16 sps:$4 sm:$0xff]  }
 0x1ad   :  { %2752 = vmatprep.subr.bf16.mxu0 %v4074_v44  ;;  %v4149_v44 = vld [vmem:[#allocation8 + $0x2ac] ss:$16 sps:$4 sm:$0xff]  }
 0x1b0   :  { %2753 = vmatpush2.bf16.msra.mxu0 %v4072_v45  ;;  %v4147_v45 = vld [vmem:[#allocation8 + $0x2a8] ss:$16 sps:$4 sm:$0xff]  }
 0x1b1   :  { %2754 = vmatprep.subr.bf16.mxu0 %v4080_v46  ;;  %v4152_v46 = vld [vmem:[#allocation8 + $0x28c] ss:$16 sps:$4 sm:$0xff]  }
 0x1b4   :  { %2755 = vmatpush2.bf16.msra.mxu0 %v4078_v47  ;;  %v4150_v47 = vld [vmem:[#allocation8 + $0x288] ss:$16 sps:$4 sm:$0xff]  }
 0x1b5   :  { %2756 = vmatprep.subr.bf16.mxu0 %v4086_v48  ;;  %v4155_v48 = vld [vmem:[#allocation8 + $0x26c] ss:$16 sps:$4 sm:$0xff]  }
 0x1b8   :  { %2757 = vmatpush2.bf16.msra.mxu0 %v4084_v50  ;;  %v4153_v50 = vld [vmem:[#allocation8 + $0x268] ss:$16 sps:$4 sm:$0xff]  }
 0x1b9   :  { %2758 = vmatprep.subr.bf16.mxu0 %v4092_v53  ;;  %v4158_v53 = vld [vmem:[#allocation8 + $0x24c] ss:$16 sps:$4 sm:$0xff]  }
 0x1bc   :  { %2759 = vmatpush2.bf16.msra.mxu0 %v4090_v54  ;;  %v4156_v54 = vld [vmem:[#allocation8 + $0x248] ss:$16 sps:$4 sm:$0xff]  }
 0x1bd   :  { %2760 = vmatprep.subr.bf16.mxu0 %v4098_v57  ;;  %v4161_v57 = vld [vmem:[#allocation8 + $0x22c] ss:$16 sps:$4 sm:$0xff]  }
 0x1bf   :  { %v1753_v0 = vpop.f32.mrf.mxu0 }
 0x1c0   :  { %2761 = vmatpush2.bf16.msra.mxu0 %v4096_v58  ;;  %v1754_v19 = vadd.f32 %v1753_v0, %v1711_v13  ;;  %v4159_v58 = vld [vmem:[#allocation8 + $0x228] ss:$16 sps:$4 sm:$0xff]   ;;  %v4182_v13 = vld [vmem:[#allocation8 + $0x34c] ss:$16 sps:$4 sm:$0xff]  }
 0x1c1   :  { %2762 = vmatprep.subr.bf16.mxu0 %v4104_v11  ;;  %v1755_v1 = vpop.f32.mrf.mxu0  ;;  %v4164_v11 = vld [vmem:[#allocation8 + $0x20c] ss:$16 sps:$4 sm:$0xff]   ;;  %v4171_v0 = vld [vmem:[#allocation8 + $0x3a8] ss:$16 sps:$4 sm:$0xff]  }
 0x1c2   :  { %v1756_v18 = vadd.f32 %v1755_v1, %v1713_v12  ;;  %v4189_v1 = vld [vmem:[#allocation10 + $0x78] sm:$0xff]  }
 0x1c3   :  { %v1757_v6 = vpop.f32.mrf.mxu0  ;;  %v4177_v12 = vld [vmem:[#allocation8 + $0x368] ss:$16 sps:$4 sm:$0xff]  }
 0x1c4   :  { %2763 = vmatpush2.bf16.msra.mxu0 %v4102_v4  ;;  %v1758_v23 = vadd.f32 %v1757_v6, %v1715_v17  ;;  %v4162_v4 = vld [vmem:[#allocation8 + $0x208] ss:$16 sps:$4 sm:$0xff]   ;;  %v4191_v6 = vld [vmem:[#allocation10 + $0x70] sm:$0xff]  }
 0x1c5   :  { %2764 = vmatprep.subr.bf16.mxu0 %v4110_v49  ;;  %v1759_v10 = vpop.f32.mrf.mxu0  ;;  %v4167_v49 = vld [vmem:[#allocation8 + $0x3ec] ss:$16 sps:$4 sm:$0xff]   ;;  %v4180_v17 = vld [vmem:[#allocation8 + $0x348] ss:$16 sps:$4 sm:$0xff]  }
 0x1c6   :  { %v1760_v28 = vadd.f32 %v1759_v10, %v1717_v22  ;;  %v4193_v10 = vld [vmem:[#allocation10 + $0x68] sm:$0xff]  }
 0x1c7   :  { %v4188_v22 = vld [vmem:[#allocation8 + $0x30c] ss:$16 sps:$4 sm:$0xff]  }
 0x1c8   :  { %2765 = vmatpush2.bf16.msra.mxu0 %v4108_v60  ;;  %v4165_v60 = vld [vmem:[#allocation8 + $0x3e8] ss:$16 sps:$4 sm:$0xff]  }
 0x1c9   :  { %2766 = vmatprep.subr.bf16.mxu0 %v4116_v61  ;;  %v4170_v61 = vld [vmem:[#allocation8 + $0x3cc] ss:$16 sps:$4 sm:$0xff]  }
 0x1cc   :  { %2767 = vmatpush2.bf16.msra.mxu0 %v4114_v62  ;;  %v4168_v62 = vld [vmem:[#allocation8 + $0x3c8] ss:$16 sps:$4 sm:$0xff]  }
 0x1cd   :  { %3592 = vmatprep.subr.bf16.mxu0 %v4189_v1 }
 0x1cf   :  { %2769 = vmatmul.mubr.bf16.vlgmr.msra.gmra.mxu0 %v4455_v51 }
 0x1d0   :  { %3593 = vmatpush3.bf16.msra.mxu0 %v4190_v5 }
 0x1d1   :  { %3594 = vmatprep.subr.bf16.mxu0 %v4191_v6 }
 0x1d4   :  { %3595 = vmatpush3.bf16.msra.mxu0 %v4192_v9 }
 0x1d5   :  { %3596 = vmatprep.subr.bf16.mxu0 %v4193_v10 }
 0x1df   :  { %v1839_v16 = vpop.f32.mrf.mxu0 }
 0x1e0   :  { %v1796_v15 = vpop.f32.mrf.mxu1 }
 0x1e1   :  { %v1841_v21 = vpop.f32.mrf.mxu0  ;;  %v1797_v25 = vadd.f32 %v1796_v15, %v1754_v19  ;;  %v4194_v15 = vld [vmem:[#allocation10 + $0x28] sm:$0xff]   ;;  %v4196_v19 = vld [vmem:[#allocation10 + $0x20] sm:$0xff]  }
 0x1e2   :  { %v1798_v20 = vpop.f32.mrf.mxu1  ;;  %3597 = vmatpush3.bf16.msra.mxu0 %v4194_v15 }
 0x1e3   :  { %v1799_v24 = vadd.f32 %v1798_v20, %v1756_v18  ;;  %v1843_v27 = vpop.f32.mrf.mxu0  ;;  %v1840_v32 = vadd.f32 %v1839_v16, %v1797_v25  ;;  %v4195_v16 = vld [vmem:[#allocation10 + $0x60] sm:$0xff]   ;;  %v4185_v18 = vld [vmem:[#allocation8 + $0x32c] ss:$16 sps:$4 sm:$0xff]   ;;  %v4199_v25 = vld [vmem:[#allocation10 + $0x50] sm:$0xff]  }
 0x1e4   :  { %v1800_v26 = vpop.f32.mrf.mxu1  ;;  %3598 = vmatprep.subr.bf16.mxu0 %v4195_v16  ;;  %v4197_v20 = vld [vmem:[#allocation10 + $0x58] sm:$0xff]  }
 0x1e5   :  { %v1801_v29 = vadd.f32 %v1800_v26, %v1758_v23  ;;  %v1842_v51 = vadd.f32 %v1841_v21, %v1799_v24  ;;  %v1845_v33 = vpop.f32.mrf.mxu0  ;;  %v1850_v38 = vmax.f32 %v1840_v32, 0.0  ;;  %v4183_v21 = vld [vmem:[#allocation8 + $0x328] ss:$16 sps:$4 sm:$0xff]   ;;  %v4200_v26 = vld [vmem:[#allocation10 + $0x10] sm:$0xff]  }
 0x1e6   :  { %v1802_v59 = vpop.f32.mrf.mxu1  ;;  %3599 = vmatpush3.bf16.msra.mxu0 %v4196_v19  ;;  %v4198_v23 = vld [vmem:[#allocation10 + $0x18] sm:$0xff]   ;;  %v4208_v32 = vld [vmem:[#allocation10 + $0xb0] sm:$0xff]  }
 0x1e7   :  { %v1844_v30 = vadd.f32 %v1843_v27, %v1801_v29  ;;  %v1803_v31 = vadd.f32 %v1802_v59, %v1760_v28  ;;  %v1851_v36 = vmax.f32 %v1842_v51, 0.0  ;;  %3600 = vmatprep.subr.bf16.mxu0 %v4197_v20  ;;  %v4186_v24 = vld [vmem:[#allocation8 + $0x308] ss:$16 sps:$4 sm:$0xff]   ;;  %v4203_v29 = vld [vmem:[#allocation10 + $0x40] sm:$0xff]  }
 0x1e8   :  { %v4201_v27 = vld [vmem:[#allocation10 + $0x48] sm:$0xff]   ;;  %v4204_v59 = vld [vmem:[#allocation10] sm:$0xff]   ;;  %v4205_v51 = vld [vmem:[#allocation10 + $0xf8] sm:$0xff]  }
 0x1e9   :  { %v1846_v14 = vadd.f32 %v1845_v33, %v1803_v31  ;;  %v1854_v34 = vmax.f32 %v1844_v30, 0.0  ;;  %v4202_v28 = vld [vmem:[#allocation10 + $0x8] sm:$0xff]   ;;  %v4206_v30 = vld [vmem:[#allocation10 + $0xb8] sm:$0xff]   ;;  %v4207_v31 = vld [vmem:[#allocation10 + $0xf0] sm:$0xff]  }
 0x1ea   :  { %3601 = vmatpush3.bf16.msra.mxu0 %v4198_v23  ;;  %v4209_v33 = vld [vmem:[#allocation10 + $0xe8] sm:$0xff]  }
 0x1eb   :  { %v1855_v37 = vmax.f32 %v1846_v14, 0.0  ;;  %v4467_v41 = vpack.c.bf16 %v1854_v34, %v1850_v38  ;;  %3602 = vmatprep.subr.bf16.mxu0 %v4199_v25  ;;  %v4210_v14 = vld [vmem:[#allocation10 + $0xa8] sm:$0xff]   ;;  %v4211_v34 = vld [vmem:[#allocation10 + $0xe0] sm:$0xff]   ;;  %v4214_v38 = vld [vmem:[#allocation10 + $0x98] sm:$0xff]  }
 0x1ed   :  { %v1859_v39 = vpack.c.bf16 %v1855_v37, %v1851_v36  ;;  %v4212_v36 = vld [vmem:[#allocation10 + $0xa0] sm:$0xff]   ;;  %v4213_v37 = vld [vmem:[#allocation10 + $0xd8] sm:$0xff]  }
 0x1ee   :  { %3603 = vmatpush3.bf16.msra.mxu0 %v4200_v26 }
 0x1ef   :  { %2725 = vmatprep.mubr.bf16.mxu1 %v1859_v39  ;;  %3604 = vmatprep.subr.bf16.mxu0 %v4201_v27 }
 0x1f0   :  { %2726 = vmatmul.mubr.bf16.vlgmr.msra.gmra.mxu1 %v4467_v41 }
 0x1f1   :  { %2780 = vmatpush1.bf16.msra.mxu1 %v4141_v40  ;;  %2811 = vmatprep.mubr.bf16.mxu1 %v1859_v39  ;;  %v4215_v39 = vld [vmem:[#allocation10 + $0xd0] sm:$0xff]  }
 0x1f2   :  { %2781 = vmatprep.subr.bf16.mxu1 %v4146_v42  ;;  %3605 = vmatpush3.bf16.msra.mxu0 %v4202_v28  ;;  %v4216_v40 = vld [vmem:[#allocation10 + $0x90] sm:$0xff]   ;;  %v4218_v42 = vld [vmem:[#allocation10 + $0x88] sm:$0xff]  }
 0x1f3   :  { %3606 = vmatprep.subr.bf16.mxu0 %v4203_v29 }
 0x1f5   :  { %2782 = vmatpush1.bf16.msra.mxu1 %v4144_v43  ;;  %v4219_v43 = vld [vmem:[#allocation10 + $0xc0] sm:$0xff]  }
 0x1f6   :  { %2783 = vmatprep.subr.bf16.mxu1 %v4149_v44  ;;  %3607 = vmatpush3.bf16.msra.mxu0 %v4204_v59  ;;  %v4220_v44 = vld [vmem:[#allocation10 + $0x80] sm:$0xff]  }
 0x1f9   :  { %2784 = vmatpush1.bf16.msra.mxu1 %v4147_v45 }
 0x1fa   :  { %2785 = vmatprep.subr.bf16.mxu1 %v4152_v46 }
 0x1fd   :  { %2786 = vmatpush1.bf16.msra.mxu1 %v4150_v47  ;;  %v1988_v47 = vld [vmem:[%s4492_s4] sm:$0xf] }
 0x1fe   :  { %2787 = vmatprep.subr.bf16.mxu1 %v4155_v48  ;;  %v2001_v15 = vrot.slane %v1988_v47, %v338_v3 }
 0x201   :  { %2788 = vmatpush1.bf16.msra.mxu1 %v4153_v50  ;;  %v1997_v50 = vrot.slane %v1988_v47, %v334_v55 }
 0x202   :  { %2789 = vmatprep.subr.bf16.mxu1 %v4158_v53  ;;  %v1993_v53 = vrot.slane %v1988_v47, %v330_v56 }
 0x205   :  { %2790 = vmatpush1.bf16.msra.mxu1 %v4156_v54 }
 0x206   :  { %2791 = vmatprep.subr.bf16.mxu1 %v4161_v57 }
 0x209   :  { %2792 = vmatpush1.bf16.msra.mxu1 %v4159_v58 }
 0x20a   :  { %2793 = vmatprep.subr.bf16.mxu1 %v4164_v11 }
 0x20d   :  { %2794 = vmatpush1.bf16.msra.mxu1 %v4162_v4 }
 0x20e   :  { %2795 = vmatprep.subr.bf16.mxu1 %v4167_v49 }
 0x211   :  { %2796 = vmatpush2.bf16.msra.mxu1 %v4165_v60 }
 0x212   :  { %2797 = vmatprep.subr.bf16.mxu1 %v4170_v61 }
 0x215   :  { %2798 = vmatpush2.bf16.msra.mxu1 %v4168_v62 }
 0x216   :  { %2799 = vmatprep.subr.bf16.mxu1 %v4173_v63 }
 0x219   :  { %2800 = vmatpush2.bf16.msra.mxu1 %v4171_v0 }
 0x21a   :  { %2801 = vmatprep.subr.bf16.mxu1 %v4176_v35 }
 0x21d   :  { %2802 = vmatpush2.bf16.msra.mxu1 %v4174_v7 }
 0x21e   :  { %2803 = vmatprep.subr.bf16.mxu1 %v4179_v8 }
 0x221   :  { %2804 = vmatpush2.bf16.msra.mxu1 %v4177_v12 }
 0x222   :  { %2805 = vmatprep.subr.bf16.mxu1 %v4182_v13  ;;  %v2005_v13 = vrot.slane %v1988_v47, %v342_v2 }
 0x225   :  { %2806 = vmatpush2.bf16.msra.mxu1 %v4180_v17 }
 0x226   :  { %2807 = vmatprep.subr.bf16.mxu1 %v4185_v18 }
 0x229   :  { %2808 = vmatpush2.bf16.msra.mxu1 %v4183_v21 }
 0x22a   :  { %2809 = vmatprep.subr.bf16.mxu1 %v4188_v22 }
 0x22d   :  { %2810 = vmatpush2.bf16.msra.mxu1 %v4186_v24 }
 0x22e   :  { %3614 = vmatprep.subr.bf16.mxu1 %v4205_v51 }
 0x230   :  { %2812 = vmatmul.mubr.bf16.vlgmr.msra.gmra.mxu1 %v4467_v41  ;;  %v4217_v41 = vld [vmem:[#allocation10 + $0xc8] sm:$0xff]  }
 0x231   :  { %3615 = vmatpush3.bf16.msra.mxu1 %v4206_v30 }
 0x232   :  { %3616 = vmatprep.subr.bf16.mxu1 %v4207_v31 }
 0x235   :  { %3617 = vmatpush3.bf16.msra.mxu1 %v4208_v32 }
 0x236   :  { %3618 = vmatprep.subr.bf16.mxu1 %v4209_v33 }
 0x239   :  { %3619 = vmatpush3.bf16.msra.mxu1 %v4210_v14  ;;  %v3559_v14 = vld [vmem:[%s4494_s6] ss:$0 sm:$0xff] }
 0x23a   :  { %3620 = vmatprep.subr.bf16.mxu1 %v4211_v34 }
 0x23d   :  { %3621 = vmatpush3.bf16.msra.mxu1 %v4212_v36 }
 0x23e   :  { %3622 = vmatprep.subr.bf16.mxu1 %v4213_v37 }
 0x241   :  { %3623 = vmatpush3.bf16.msra.mxu1 %v4214_v38 }
 0x242   :  { %3624 = vmatprep.subr.bf16.mxu1 %v4215_v39 }
 0x245   :  { %3625 = vmatpush3.bf16.msra.mxu1 %v4216_v40 }
 0x246   :  { %3626 = vmatprep.subr.bf16.mxu1 %v4217_v41 }
 0x249   :  { %3627 = vmatpush3.bf16.msra.mxu1 %v4218_v42 }
 0x24a   :  { %3628 = vmatprep.subr.bf16.mxu1 %v4219_v43 }
 0x24d   :  { %3629 = vmatpush3.bf16.msra.mxu1 %v4220_v44 }
 0x24f   :  { %v2684_v45 = vpop.f32.mrf.mxu0 }
 0x250   :  { %v2685_v49 = vadd.f32 %v2684_v45, %v1993_v53 }
 0x251   :  { %v2686_v46 = vpop.f32.mrf.mxu0 }
 0x252   :  { %v2687_v11 = vadd.f32 %v2686_v46, %v1997_v50 }
 0x253   :  { %v2688_v48 = vpop.f32.mrf.mxu0 }
 0x254   :  { %v2689_v4 = vadd.f32 %v2688_v48, %v1993_v53 }
 0x255   :  { %v2690_v57 = vpop.f32.mrf.mxu0 }
 0x256   :  { %v2691_v61 = vadd.f32 %v2690_v57, %v1997_v50 }
 0x28f   :  { %v2770_v56 = vpop.f32.mrf.mxu0 }
 0x290   :  { %v2771_v21 = vadd.f32 %v2770_v56, %v2001_v15 }
 0x291   :  { %v2772_v10 = vpop.f32.mrf.mxu0 }
 0x292   :  { %v2773_v19 = vadd.f32 %v2772_v10, %v2005_v13 }
 0x293   :  { %v2774_v12 = vpop.f32.mrf.mxu0 }
 0x294   :  { %v2775_v20 = vadd.f32 %v2774_v12, %v2001_v15 }
 0x295   :  { %v2776_v17 = vpop.f32.mrf.mxu0 }
 0x296   :  { %v2777_v23 = vadd.f32 %v2776_v17, %v2005_v13 }
 0x2b0   :  { %v2727_v54 = vpop.f32.mrf.mxu1 }
 0x2b1   :  { %v2728_v0 = vadd.f32 %v2727_v54, %v2685_v49 }
 0x2b2   :  { %v2729_v58 = vpop.f32.mrf.mxu1 }
 0x2b3   :  { %v2730_v62 = vadd.f32 %v2729_v58, %v2687_v11  ;;  %v2822_v55 = vmax.f32 %v2728_v0, 0.0 }
 0x2b4   :  { %v2731_v60 = vpop.f32.mrf.mxu1 }
 0x2b5   :  { %v2732_v63 = vadd.f32 %v2731_v60, %v2689_v4  ;;  %v2823_v6 = vmax.f32 %v2730_v62, 0.0 }
 0x2b6   :  { %v2733_v35 = vpop.f32.mrf.mxu1 }
 0x2b7   :  { %v2734_v1 = vadd.f32 %v2733_v35, %v2691_v61  ;;  %v2826_v5 = vmax.f32 %v2732_v63, 0.0 }
 0x2b9   :  { %v2827_v7 = vmax.f32 %v2734_v1, 0.0  ;;  %v2830_v9 = vpack.c.bf16 %v2826_v5, %v2822_v55 }
 0x2bb   :  { %v2831_v8 = vpack.c.bf16 %v2827_v7, %v2823_v6 }
 0x2bd   :  { %3129 = vmatprep.mubr.bf16.mxu0 %v2831_v8 }
 0x2be   :  { %3130 = vmatmul.mubr.bf16.vlgmr.msra.gmra.mxu0 %v2830_v9 }
 0x2f0   :  { %v2813_v16 = vpop.f32.mrf.mxu1 }
 0x2f1   :  { %v2814_v26 = vadd.f32 %v2813_v16, %v2771_v21 }
 0x2f2   :  { %v2815_v18 = vpop.f32.mrf.mxu1 }
 0x2f3   :  { %v2816_v24 = vadd.f32 %v2815_v18, %v2773_v19  ;;  %v2824_v2 = vmax.f32 %v2814_v26, 0.0 }
 0x2f4   :  { %v2817_v22 = vpop.f32.mrf.mxu1 }
 0x2f5   :  { %v2818_v25 = vadd.f32 %v2817_v22, %v2775_v20  ;;  %v2825_v59 = vmax.f32 %v2816_v24, 0.0 }
 0x2f6   :  { %v2819_v27 = vpop.f32.mrf.mxu1 }
 0x2f7   :  { %v2820_v28 = vadd.f32 %v2819_v27, %v2777_v23  ;;  %v2828_v29 = vmax.f32 %v2818_v25, 0.0 }
 0x2f9   :  { %v2829_v51 = vmax.f32 %v2820_v28, 0.0  ;;  %v2832_v52 = vpack.c.bf16 %v2828_v29, %v2824_v2 }
 0x2fb   :  { %v2833_v30 = vpack.c.bf16 %v2829_v51, %v2825_v59 }
 0x2fd   :  { %3170 = vmatprep.mubr.bf16.mxu1 %v2833_v30 }
 0x2fe   :  { %3171 = vmatmul.mubr.bf16.vlgmr.msra.gmra.mxu1 %v2832_v52 }
 0x37e   :  { %v3608_v3 = vpop.f32.mrf.mxu0 }
 0x380   :  { %v3609_v31 = vpop.f32.mrf.mxu0 }
 0x381   :  { %v3610_v33 = vadd.f32 %v3609_v31, %v3608_v3 }
 0x382   :  { %v3611_v32 = vpop.f32.mrf.mxu0 }
 0x383   :  { %v3132_v38 = vadd.f32 %v3610_v33, %v3559_v14 }
 0x384   :  { %v3612_v34 = vpop.f32.mrf.mxu0 }
 0x385   :  { %v3613_v39 = vadd.f32 %v3612_v34, %v3611_v32 }
 0x387   :  { %v3135_v44 = vadd.f32 %v3613_v39, %v3559_v14 }
 0x3be   :  { %v3630_v36 = vpop.f32.mrf.mxu1 }
 0x3c0   :  { %v3631_v37 = vpop.f32.mrf.mxu1 }
 0x3c1   :  { %v3632_v40 = vadd.f32 %v3631_v37, %v3630_v36 }
 0x3c2   :  { %v3633_v41 = vpop.f32.mrf.mxu1 }
 0x3c3   :  { %v3173_v42 = vadd.f32 %v3632_v40, %v3132_v38 }
 0x3c4   :  { %v3634_v43 = vpop.f32.mrf.mxu1 }
 0x3c5   :  { %3179 = vst [vmem:[#allocation11] sm:$0xff] %v3173_v42  ;;  %v3635_v45 = vadd.f32 %v3634_v43, %v3633_v41 }
 0x3c7   :  { %v3176_v46 = vadd.f32 %v3635_v45, %v3135_v44 }
 0x3c9   :  { %3180 = vst [vmem:[#allocation11 + $0x8] sm:$0xff] %v3176_v46 }
 0x3ca   :  { %4334 = shalt.err (!%p4331_p1)
}
 0x3cb   :  { %s4364_s6 = smov 128   ;;  %s4365_s10 = smov 8  }
 0x3cc   :  { %3192 = dma.vmem_to_hbm [thread:$0]  %s3187_s8, 256, %s4495_s7, [#allocation4], %s4364_s6, %s4364_s6, %s4365_s10  }
 0x3cd   :  { %4349 = dma.done.wait [#allocation4], 256  }
 0x3ce   :  { %4350 = vsyncadd [#allocation4], 4294967040 }
 0x3cf   :  { %3196 = vsyncpa [#allocation3], 1 }
 0x3d0   :  { %3197 = vsyncpa [#allocation6], 1 }
 0x3d1   :  { %3198 = vsyncpa [#allocation9], 1 }
 0x3d2   :  { %3199 = vsyncpa [#allocation4], 1 }

</bundles_post_ra>
